<compile_context>
chip_gen: v5e
topology: v5e:2x2
jax: 0.10.0
libtpu: 0.0.40
codegen_flags: <defaults>
</compile_context>

<pallas_src>
import jax
import jax.numpy as jnp
from jax.experimental import pallas as pl
from jax.experimental.pallas import tpu as pltpu

# ----------------------------- config ---------------------------------------
VOCAB = 128        # synthetic vocab size
MAXPOS = 32        # max position embeddings
TYPES = 2          # token-type vocab
H = 64             # hidden size
NH = 2             # attention heads
HD = H // NH       # head dim
INTER = 128        # FFN intermediate size
NUM_LAYERS = 2     # encoder layers
NUM_LABELS = 9     # NER label count
LPAD = 128         # lane-dense padded label dim for the HBM-visible logits slab
NLL_COL = NUM_LABELS          # spare lane carrying per-token NLL
CNT_COL = NUM_LABELS + 1      # spare lane carrying per-token valid flag
LN_EPS = 1e-12     # BERT LayerNorm eps
IGNORE_INDEX = -100
NEG_BIG = -1e9     # used to drop padded classes from the in-kernel LSE


# --------------------------- kernel helpers ---------------------------------
def _layernorm(x, g, b):
    mu = jnp.mean(x, axis=-1, keepdims=True)
    var = jnp.mean((x - mu) ** 2, axis=-1, keepdims=True)
    return (x - mu) * jax.lax.rsqrt(var + LN_EPS) * g + b


def _gelu(x):
    # tanh-approximation GELU (EUP-friendly); BERT checkpoints use erf-GELU,
    # irrelevant for synthetic weights.
    return 0.5 * x * (1.0 + jnp.tanh(0.7978845608028654 * (x + 0.044715 * x * x * x)))


# ---------------------------- fused kernel ----------------------------------
def ner_seq_kernel(intpack_ref,    # (S, 3) i32: [ids | labels | mask]
                   kbias_ref,      # (1, 1, S) f32 additive key bias
                   postype_ref,    # (S, H) f32: pos_emb[:S] + type_emb[0]
                   wemb_ref,       # (VOCAB, H) bf16
                   embln_ref,      # (2, H) f32: [gamma; beta]
                   wqkv_ref,       # (L, H, 3H) bf16 (Q cols pre-scaled by 1/sqrt(HD))
                   bqkv_ref,       # (L, 1, 3H) f32
                   wo_ref,         # (L, H, H) bf16
                   wi_ref,         # (L, H, INTER) bf16
                   wf_ref,         # (L, INTER, H) bf16
                   lvec_ref,       # (L, 8, H) f32: rows [bo, ln1g, ln1b, bf, ln2g, ln2b, 0, 0]
                   bi_ref,         # (L, 1, INTER) f32
                   cw_ref,         # (H, LPAD) bf16 (cols >= NUM_LABELS zero)
                   cb_ref,         # (1, LPAD) f32
                   out_ref):       # (S, LPAD) f32 logits slab (+ NLL/valid lanes)
    S = intpack_ref.shape[0]
    ids = intpack_ref[:, 0:1]                                       # (S,1) i32
    labels = intpack_ref[:, 1:2]                                    # (S,1) i32
    maskf = intpack_ref[:, 2:3].astype(jnp.float32)                 # (S,1) f32

    # ---- embeddings: one-hot MXU gather + fused pos/type table + LayerNorm --
    # TODO(synk): for a realistic ~30k vocab, replace the one-hot matmul with a
    # DMA row-gather from HBM (memory_space=pl.ANY + make_async_copy).
    vocab_iota = jax.lax.broadcasted_iota(jnp.int32, (S, VOCAB), 1)
    onehot = (vocab_iota == ids).astype(jnp.bfloat16)
    emb = jnp.dot(onehot, wemb_ref[...], preferred_element_type=jnp.float32)
    emb = emb + postype_ref[...]
    x = _layernorm(emb, embln_ref[0:1, :], embln_ref[1:2, :])       # (S,H) f32

    kb = kbias_ref[0]                                               # (1,S) f32

    # ---- transformer encoder layers (static unroll, weights resident) -------
    for l in range(NUM_LAYERS):
        # fused QKV projection (score scale already folded into Q weights)
        qkv = jnp.dot(x.astype(jnp.bfloat16), wqkv_ref[l],
                      preferred_element_type=jnp.float32) + bqkv_ref[l]
        attn_out = None
        for h in range(NH):
            qh = qkv[:, h * HD:(h + 1) * HD].astype(jnp.bfloat16)
            kh = qkv[:, H + h * HD:H + (h + 1) * HD].astype(jnp.bfloat16)
            vh = qkv[:, 2 * H + h * HD:2 * H + (h + 1) * HD].astype(jnp.bfloat16)
            scores = jax.lax.dot_general(
                qh, kh, (((1,), (1,)), ((), ())),
                preferred_element_type=jnp.float32) + kb            # (S,S) f32
            m = jnp.max(scores, axis=-1, keepdims=True)
            p = jnp.exp(scores - m)
            attn = p * pl.reciprocal(jnp.sum(p, axis=-1, keepdims=True), approx=True)
            ctx = jnp.dot(attn.astype(jnp.bfloat16), vh,
                          preferred_element_type=jnp.float32)       # (S,HD)
            # push context through this head's Wo row-slice; accumulate
            contrib = jnp.dot(ctx.astype(jnp.bfloat16),
                              wo_ref[l, h * HD:(h + 1) * HD, :],
                              preferred_element_type=jnp.float32)   # (S,H)
            attn_out = contrib if attn_out is None else attn_out + contrib
        attn_out = attn_out + lvec_ref[l, 0:1, :]                   # + bo
        x = _layernorm(x + attn_out, lvec_ref[l, 1:2, :], lvec_ref[l, 2:3, :])

        hid = _gelu(jnp.dot(x.astype(jnp.bfloat16), wi_ref[l],
                            preferred_element_type=jnp.float32) + bi_ref[l])
        ffn = jnp.dot(hid.astype(jnp.bfloat16), wf_ref[l],
                      preferred_element_type=jnp.float32) + lvec_ref[l, 3:4, :]
        x = _layernorm(x + ffn, lvec_ref[l, 4:5, :], lvec_ref[l, 5:6, :])

    # ---- dropout (inference identity) + classifier --------------------------
    # TODO(synk): training-mode dropout would need pltpu.prng_seed/prng_random_bits.
    logits = jnp.dot(x.astype(jnp.bfloat16), cw_ref[...],
                     preferred_element_type=jnp.float32) + cb_ref[...]  # (S,LPAD)

    # ---- masked cross-entropy per token; stats stashed in spare lanes -------
    labels_act = jnp.where(maskf > 0.5, labels, jnp.full_like(labels, IGNORE_INDEX))
    col = jax.lax.broadcasted_iota(jnp.int32, (S, LPAD), 1)
    ll = jnp.where(col < NUM_LABELS, logits, jnp.float32(NEG_BIG))  # drop padded classes
    m = jnp.max(ll, axis=-1, keepdims=True)
    lse = m + jnp.log(jnp.sum(jnp.exp(ll - m), axis=-1, keepdims=True))
    picked = jnp.sum(jnp.where(col == labels_act, logits, 0.0), axis=-1, keepdims=True)
    valid = (labels_act != IGNORE_INDEX).astype(jnp.float32)        # (S,1)
    nll = (lse - picked) * valid                                    # (S,1)

    slab = jnp.where(col == NLL_COL, nll, logits)
    slab = jnp.where(col == CNT_COL, valid, slab)
    out_ref[...] = slab


# ------------------------------ pallas_call wrapper --------------------------
def _fused_call(params, intpack, key_bias, B, S):
    BS = B * S
    full_vmem = pl.BlockSpec(memory_space=pltpu.MemorySpace.VMEM)
    grid_spec = pltpu.PrefetchScalarGridSpec(
        num_scalar_prefetch=0,
        grid=(B,),
        in_specs=[
            pl.BlockSpec((S, 3), lambda b: (b, 0)),        # int pack (per sequence)
            pl.BlockSpec((1, 1, S), lambda b: (b, 0, 0)),  # key bias (per sequence)
            pl.BlockSpec((S, H), lambda b: (0, 0)),        # pos+type table rows [0:S)
            full_vmem,   # word_emb
            full_vmem,   # emb_ln
            full_vmem,   # wqkv
            full_vmem,   # bqkv
            full_vmem,   # wo
            full_vmem,   # wi
            full_vmem,   # wf
            full_vmem,   # lvec
            full_vmem,   # bi
            full_vmem,   # cls_w
            full_vmem,   # cls_b
        ],
        out_specs=pl.BlockSpec((S, LPAD), lambda b: (b, 0)),
    )
    return pl.pallas_call(
        ner_seq_kernel,
        out_shape=jax.ShapeDtypeStruct((BS, LPAD), jnp.float32),
        grid_spec=grid_spec,
        compiler_params=pltpu.CompilerParams(
            dimension_semantics=("parallel",)),
    )(intpack, key_bias,
      params["postype"], params["word_emb"], params["emb_ln"],
      params["wqkv"], params["bqkv"], params["wo"], params["wi"], params["wf"],
      params["lvec"], params["bi"], params["cls_w"], params["cls_b"])


# ------------------------------ parameters ----------------------------------
def init_params(key):
    def nrm(k, shape, scale=0.02):
        return (scale * jax.random.normal(k, shape)).astype(jnp.float32)

    keys = iter(jax.random.split(key, 16))
    word_emb = nrm(next(keys), (VOCAB, H))
    pos_emb = nrm(next(keys), (MAXPOS, H))
    type_emb = nrm(next(keys), (TYPES, H))
    wqkv = nrm(next(keys), (NUM_LAYERS, H, 3 * H))
    # fold the 1/sqrt(HD) attention-score scale into the Q columns
    wqkv = wqkv.at[:, :, :H].multiply(1.0 / (HD ** 0.5))
    wo = nrm(next(keys), (NUM_LAYERS, H, H))
    wi = nrm(next(keys), (NUM_LAYERS, H, INTER))
    wf = nrm(next(keys), (NUM_LAYERS, INTER, H))
    cls_core = nrm(next(keys), (H, NUM_LABELS))

    # per-layer small vectors packed into one slab:
    # rows [bo, ln1_g, ln1_b, bf, ln2_g, ln2_b, 0, 0]
    lvec = jnp.zeros((NUM_LAYERS, 8, H), jnp.float32)
    lvec = lvec.at[:, 1, :].set(1.0)   # ln1 gamma
    lvec = lvec.at[:, 4, :].set(1.0)   # ln2 gamma

    return {
        # fused additive table: position embedding + token_type_id==0 embedding
        "postype": pos_emb + type_emb[0:1],                       # (MAXPOS, H) f32
        "word_emb": word_emb.astype(jnp.bfloat16),
        "emb_ln": jnp.concatenate([jnp.ones((1, H), jnp.float32),
                                   jnp.zeros((1, H), jnp.float32)], axis=0),
        "wqkv": wqkv.astype(jnp.bfloat16),
        "bqkv": jnp.zeros((NUM_LAYERS, 1, 3 * H), jnp.float32),   # (Q part pre-scaled: zeros)
        "wo": wo.astype(jnp.bfloat16),
        "wi": wi.astype(jnp.bfloat16),
        "wf": wf.astype(jnp.bfloat16),
        "lvec": lvec,
        "bi": jnp.zeros((NUM_LAYERS, 1, INTER), jnp.float32),
        "cls_w": jnp.zeros((H, LPAD), jnp.float32).at[:, :NUM_LABELS]
                    .set(cls_core).astype(jnp.bfloat16),
        "cls_b": jnp.zeros((1, LPAD), jnp.float32),
    }


# ------------------------------ forward pass --------------------------------
@jax.jit
def equipment_ner_forward(params, input_ids, attention_mask, labels=None):
    B, S = input_ids.shape
    assert S % 8 == 0 and S <= MAXPOS, "S must be a multiple of 8 and <= MAXPOS"
    BS = B * S

    ids = input_ids.astype(jnp.int32)
    maski = attention_mask.astype(jnp.int32)
    lab = jnp.zeros((B, S), jnp.int32) if labels is None else labels.astype(jnp.int32)

    # one consolidated int input slab: [ids | labels | mask]
    intpack = jnp.stack([ids, lab, maski], axis=-1).reshape(BS, 3)
    # per-sequence additive key bias (BERT's -10000 padding mask), tiny (B,1,S)
    key_bias = ((1.0 - attention_mask.astype(jnp.float32)) * -10000.0).reshape(B, 1, S)

    slab = _fused_call(params, intpack, key_bias, B, S)             # (BS, LPAD)

    logits = slab[:, :NUM_LABELS].reshape(B, S, NUM_LABELS)
    loss = None
    if labels is not None:
        nll_sum = jnp.sum(slab[:, NLL_COL])
        val_sum = jnp.sum(slab[:, CNT_COL])
        # NOTE: all-tokens-masked batch returns 0 here (PyTorch CE would give NaN).
        loss = nll_sum / jnp.maximum(val_sum, 1.0)
    return loss, logits


# ---------------------------------- main -------------------------------------
if __name__ == "__main__":
    B, S = 2, 16
    key = jax.random.PRNGKey(0)
    k_ids, k_lab = jax.random.split(key)

    input_ids = jax.random.randint(k_ids, (B, S), 0, VOCAB, dtype=jnp.int32)
    attention_mask = jnp.ones((B, S), jnp.int32).at[1, 12:].set(0)   # pad tail of seq 1
    labels = jax.random.randint(k_lab, (B, S), 0, NUM_LABELS, dtype=jnp.int32)

    params = init_params(jax.random.PRNGKey(42))

    loss, logits = equipment_ner_forward(params, input_ids, attention_mask, labels)
    jax.block_until_ready((loss, logits))

    assert logits.shape == (B, S, NUM_LABELS)
    assert loss.shape == ()
    assert bool(jnp.isfinite(loss))
    print("KERNEL_OK")
</pallas_src>

<mosaic_0001>
module attributes {stable_mosaic.version = 11 : i64} {
  func.func @ner_seq_kernel(%arg0: i32, %arg1: memref<16x3xi32, #tpu.memory_space<vmem>>, %arg2: memref<1x1x16xf32, #tpu.memory_space<vmem>>, %arg3: memref<16x64xf32, #tpu.memory_space<vmem>>, %arg4: memref<128x64xbf16, #tpu.memory_space<vmem>>, %arg5: memref<2x64xf32, #tpu.memory_space<vmem>>, %arg6: memref<2x64x192xbf16, #tpu.memory_space<vmem>>, %arg7: memref<2x1x192xf32, #tpu.memory_space<vmem>>, %arg8: memref<2x64x64xbf16, #tpu.memory_space<vmem>>, %arg9: memref<2x64x128xbf16, #tpu.memory_space<vmem>>, %arg10: memref<2x128x64xbf16, #tpu.memory_space<vmem>>, %arg11: memref<2x8x64xf32, #tpu.memory_space<vmem>>, %arg12: memref<2x1x128xf32, #tpu.memory_space<vmem>>, %arg13: memref<64x128xbf16, #tpu.memory_space<vmem>>, %arg14: memref<1x128xf32, #tpu.memory_space<vmem>>, %arg15: memref<16x128xf32, #tpu.memory_space<vmem>>) attributes {dimension_semantics = [#tpu.dimension_semantics<parallel>], iteration_bounds = array<i64: 2>, scalar_prefetch = 0 : i64, scratch_operands = 0 : i64, tpu.core_type = #tpu.core_type<tc>, window_params = [{transform_indices = @transform_0, window_bounds = array<i64: 16, 3>}, {transform_indices = @transform_1, window_bounds = array<i64: 1, 1, 16>}, {transform_indices = @transform_2, window_bounds = array<i64: 16, 64>}, {pipeline_mode = #tpu.pipeline_mode<synchronous>, transform_indices = @transform_3, window_bounds = array<i64: 128, 64>}, {pipeline_mode = #tpu.pipeline_mode<synchronous>, transform_indices = @transform_4, window_bounds = array<i64: 2, 64>}, {pipeline_mode = #tpu.pipeline_mode<synchronous>, transform_indices = @transform_5, window_bounds = array<i64: 2, 64, 192>}, {pipeline_mode = #tpu.pipeline_mode<synchronous>, transform_indices = @transform_6, window_bounds = array<i64: 2, 1, 192>}, {pipeline_mode = #tpu.pipeline_mode<synchronous>, transform_indices = @transform_7, window_bounds = array<i64: 2, 64, 64>}, {pipeline_mode = #tpu.pipeline_mode<synchronous>, transform_indices = @transform_8, window_bounds = array<i64: 2, 64, 128>}, {pipeline_mode = #tpu.pipeline_mode<synchronous>, transform_indices = @transform_9, window_bounds = array<i64: 2, 128, 64>}, {pipeline_mode = #tpu.pipeline_mode<synchronous>, transform_indices = @transform_10, window_bounds = array<i64: 2, 8, 64>}, {pipeline_mode = #tpu.pipeline_mode<synchronous>, transform_indices = @transform_11, window_bounds = array<i64: 2, 1, 128>}, {pipeline_mode = #tpu.pipeline_mode<synchronous>, transform_indices = @transform_12, window_bounds = array<i64: 64, 128>}, {pipeline_mode = #tpu.pipeline_mode<synchronous>, transform_indices = @transform_13, window_bounds = array<i64: 1, 128>}, {transform_indices = @transform_14, window_bounds = array<i64: 16, 128>}]} {
    %c0 = arith.constant 0 : index
    %c0_0 = arith.constant 0 : index
    %0 = vector.load %arg1[%c0, %c0_0] : memref<16x3xi32, #tpu.memory_space<vmem>>, vector<16x1xi32>
    %c0_1 = arith.constant 0 : index
    %c1 = arith.constant 1 : index
    %1 = vector.load %arg1[%c0_1, %c1] : memref<16x3xi32, #tpu.memory_space<vmem>>, vector<16x1xi32>
    %c0_2 = arith.constant 0 : index
    %c2 = arith.constant 2 : index
    %2 = vector.load %arg1[%c0_2, %c2] : memref<16x3xi32, #tpu.memory_space<vmem>>, vector<16x1xi32>
    %3 = arith.sitofp %2 : vector<16x1xi32> to vector<16x1xf32>
    %4 = tpu.iota {dimensions = array<i32: 1>} : vector<16x128xi32>
    %5 = vector.broadcast %0 : vector<16x1xi32> to vector<16x128xi32>
    %6 = arith.cmpi eq, %4, %5 : vector<16x128xi32>
    %7 = arith.extui %6 : vector<16x128xi1> to vector<16x128xi32>
    %8 = arith.sitofp %7 : vector<16x128xi32> to vector<16x128xf32>
    %9 = arith.truncf %8 : vector<16x128xf32> to vector<16x128xbf16>
    %c0_3 = arith.constant 0 : index
    %c0_4 = arith.constant 0 : index
    %10 = vector.load %arg4[%c0_3, %c0_4] : memref<128x64xbf16, #tpu.memory_space<vmem>>, vector<128x64xbf16>
    %cst = arith.constant dense<0.000000e+00> : vector<16x64xf32>
    %11 = tpu.matmul %9, %10, %cst {dimension_numbers = #tpu.dot_dimension_numbers<[1], [0], [0], [1], [0, 0, 1, 1], [], []>} : vector<16x128xbf16>, vector<128x64xbf16>, vector<16x64xf32> -> vector<16x64xf32>
    %c0_5 = arith.constant 0 : index
    %c0_6 = arith.constant 0 : index
    %12 = vector.load %arg3[%c0_5, %c0_6] : memref<16x64xf32, #tpu.memory_space<vmem>>, vector<16x64xf32>
    %13 = arith.addf %11, %12 : vector<16x64xf32>
    %c0_7 = arith.constant 0 : index
    %c0_8 = arith.constant 0 : index
    %14 = vector.load %arg5[%c0_7, %c0_8] : memref<2x64xf32, #tpu.memory_space<vmem>>, vector<1x64xf32>
    %c1_9 = arith.constant 1 : index
    %c0_10 = arith.constant 0 : index
    %15 = vector.load %arg5[%c1_9, %c0_10] : memref<2x64xf32, #tpu.memory_space<vmem>>, vector<1x64xf32>
    %cst_11 = arith.constant dense<0.000000e+00> : vector<16xf32>
    %16 = vector.multi_reduction <add>, %13, %cst_11 [1] : vector<16x64xf32> to vector<16xf32>
    %17 = vector.shape_cast %16 : vector<16xf32> to vector<16x1xf32>
    %cst_12 = arith.constant 6.400000e+01 : f32
    %18 = vector.broadcast %cst_12 : f32 to vector<16x1xf32>
    %19 = arith.divf %17, %18 : vector<16x1xf32>
    %20 = vector.broadcast %19 : vector<16x1xf32> to vector<16x64xf32>
    %21 = arith.subf %13, %20 : vector<16x64xf32>
    %22 = arith.mulf %21, %21 : vector<16x64xf32>
    %cst_13 = arith.constant dense<0.000000e+00> : vector<16xf32>
    %23 = vector.multi_reduction <add>, %22, %cst_13 [1] : vector<16x64xf32> to vector<16xf32>
    %24 = vector.shape_cast %23 : vector<16xf32> to vector<16x1xf32>
    %cst_14 = arith.constant 6.400000e+01 : f32
    %25 = vector.broadcast %cst_14 : f32 to vector<16x1xf32>
    %26 = arith.divf %24, %25 : vector<16x1xf32>
    %27 = vector.broadcast %19 : vector<16x1xf32> to vector<16x64xf32>
    %28 = arith.subf %13, %27 : vector<16x64xf32>
    %cst_15 = arith.constant 9.99999996E-13 : f32
    %29 = vector.broadcast %cst_15 : f32 to vector<16x1xf32>
    %30 = arith.addf %26, %29 : vector<16x1xf32>
    %31 = math.rsqrt %30 : vector<16x1xf32>
    %32 = vector.broadcast %31 : vector<16x1xf32> to vector<16x64xf32>
    %33 = arith.mulf %28, %32 : vector<16x64xf32>
    %34 = vector.broadcast %14 : vector<1x64xf32> to vector<16x64xf32>
    %35 = arith.mulf %33, %34 : vector<16x64xf32>
    %36 = vector.broadcast %15 : vector<1x64xf32> to vector<16x64xf32>
    %37 = arith.addf %35, %36 : vector<16x64xf32>
    %c0_16 = arith.constant 0 : index
    %c0_17 = arith.constant 0 : index
    %c0_18 = arith.constant 0 : index
    %38 = vector.load %arg2[%c0_16, %c0_17, %c0_18] : memref<1x1x16xf32, #tpu.memory_space<vmem>>, vector<1x1x16xf32>
    %39 = vector.shape_cast %38 : vector<1x1x16xf32> to vector<1x16xf32>
    %40 = arith.truncf %37 : vector<16x64xf32> to vector<16x64xbf16>
    %c0_19 = arith.constant 0 : index
    %c0_20 = arith.constant 0 : index
    %c0_21 = arith.constant 0 : index
    %41 = vector.load %arg6[%c0_19, %c0_20, %c0_21] : memref<2x64x192xbf16, #tpu.memory_space<vmem>>, vector<1x64x192xbf16>
    %42 = vector.shape_cast %41 : vector<1x64x192xbf16> to vector<64x192xbf16>
    %cst_22 = arith.constant dense<0.000000e+00> : vector<16x192xf32>
    %43 = tpu.matmul %40, %42, %cst_22 {dimension_numbers = #tpu.dot_dimension_numbers<[1], [0], [0], [1], [0, 0, 1, 1], [], []>} : vector<16x64xbf16>, vector<64x192xbf16>, vector<16x192xf32> -> vector<16x192xf32>
    %c0_23 = arith.constant 0 : index
    %c0_24 = arith.constant 0 : index
    %c0_25 = arith.constant 0 : index
    %44 = vector.load %arg7[%c0_23, %c0_24, %c0_25] : memref<2x1x192xf32, #tpu.memory_space<vmem>>, vector<1x1x192xf32>
    %45 = vector.shape_cast %44 : vector<1x1x192xf32> to vector<1x192xf32>
    %46 = vector.broadcast %45 : vector<1x192xf32> to vector<16x192xf32>
    %47 = arith.addf %43, %46 : vector<16x192xf32>
    %48 = vector.extract_strided_slice %47 {offsets = [0, 0], sizes = [16, 32], strides = [1, 1]} : vector<16x192xf32> to vector<16x32xf32>
    %49 = arith.truncf %48 : vector<16x32xf32> to vector<16x32xbf16>
    %50 = vector.extract_strided_slice %47 {offsets = [0, 64], sizes = [16, 32], strides = [1, 1]} : vector<16x192xf32> to vector<16x32xf32>
    %51 = arith.truncf %50 : vector<16x32xf32> to vector<16x32xbf16>
    %52 = vector.extract_strided_slice %47 {offsets = [0, 128], sizes = [16, 32], strides = [1, 1]} : vector<16x192xf32> to vector<16x32xf32>
    %53 = arith.truncf %52 : vector<16x32xf32> to vector<16x32xbf16>
    %cst_26 = arith.constant dense<0.000000e+00> : vector<16x16xf32>
    %54 = tpu.matmul %49, %51, %cst_26 {dimension_numbers = #tpu.dot_dimension_numbers<[1], [1], [0], [0], [0, 0, 1, 0], [], []>} : vector<16x32xbf16>, vector<16x32xbf16>, vector<16x16xf32> -> vector<16x16xf32>
    %55 = vector.broadcast %39 : vector<1x16xf32> to vector<16x16xf32>
    %56 = arith.addf %54, %55 : vector<16x16xf32>
    %cst_27 = arith.constant dense<0xFF800000> : vector<16xf32>
    %57 = vector.multi_reduction <maximumf>, %56, %cst_27 [1] : vector<16x16xf32> to vector<16xf32>
    %58 = vector.shape_cast %57 : vector<16xf32> to vector<16x1xf32>
    %59 = vector.broadcast %58 : vector<16x1xf32> to vector<16x16xf32>
    %60 = arith.subf %56, %59 : vector<16x16xf32>
    %61 = math.exp %60 : vector<16x16xf32>
    %cst_28 = arith.constant dense<0.000000e+00> : vector<16xf32>
    %62 = vector.multi_reduction <add>, %61, %cst_28 [1] : vector<16x16xf32> to vector<16xf32>
    %63 = vector.shape_cast %62 : vector<16xf32> to vector<16x1xf32>
    %64 = tpu.reciprocal %63 {approx = true} : vector<16x1xf32> -> vector<16x1xf32>
    %65 = vector.broadcast %64 : vector<16x1xf32> to vector<16x16xf32>
    %66 = arith.mulf %61, %65 : vector<16x16xf32>
    %67 = arith.truncf %66 : vector<16x16xf32> to vector<16x16xbf16>
    %cst_29 = arith.constant dense<0.000000e+00> : vector<16x32xf32>
    %68 = tpu.matmul %67, %53, %cst_29 {dimension_numbers = #tpu.dot_dimension_numbers<[1], [0], [0], [1], [0, 0, 1, 1], [], []>} : vector<16x16xbf16>, vector<16x32xbf16>, vector<16x32xf32> -> vector<16x32xf32>
    %69 = arith.truncf %68 : vector<16x32xf32> to vector<16x32xbf16>
    %c0_30 = arith.constant 0 : index
    %c0_31 = arith.constant 0 : index
    %c0_32 = arith.constant 0 : index
    %70 = vector.load %arg8[%c0_30, %c0_31, %c0_32] : memref<2x64x64xbf16, #tpu.memory_space<vmem>>, vector<1x32x64xbf16>
    %71 = vector.shape_cast %70 : vector<1x32x64xbf16> to vector<32x64xbf16>
    %cst_33 = arith.constant dense<0.000000e+00> : vector<16x64xf32>
    %72 = tpu.matmul %69, %71, %cst_33 {dimension_numbers = #tpu.dot_dimension_numbers<[1], [0], [0], [1], [0, 0, 1, 1], [], []>} : vector<16x32xbf16>, vector<32x64xbf16>, vector<16x64xf32> -> vector<16x64xf32>
    %73 = vector.extract_strided_slice %47 {offsets = [0, 32], sizes = [16, 32], strides = [1, 1]} : vector<16x192xf32> to vector<16x32xf32>
    %74 = arith.truncf %73 : vector<16x32xf32> to vector<16x32xbf16>
    %75 = vector.extract_strided_slice %47 {offsets = [0, 96], sizes = [16, 32], strides = [1, 1]} : vector<16x192xf32> to vector<16x32xf32>
    %76 = arith.truncf %75 : vector<16x32xf32> to vector<16x32xbf16>
    %77 = vector.extract_strided_slice %47 {offsets = [0, 160], sizes = [16, 32], strides = [1, 1]} : vector<16x192xf32> to vector<16x32xf32>
    %78 = arith.truncf %77 : vector<16x32xf32> to vector<16x32xbf16>
    %cst_34 = arith.constant dense<0.000000e+00> : vector<16x16xf32>
    %79 = tpu.matmul %74, %76, %cst_34 {dimension_numbers = #tpu.dot_dimension_numbers<[1], [1], [0], [0], [0, 0, 1, 0], [], []>} : vector<16x32xbf16>, vector<16x32xbf16>, vector<16x16xf32> -> vector<16x16xf32>
    %80 = vector.broadcast %39 : vector<1x16xf32> to vector<16x16xf32>
    %81 = arith.addf %79, %80 : vector<16x16xf32>
    %cst_35 = arith.constant dense<0xFF800000> : vector<16xf32>
    %82 = vector.multi_reduction <maximumf>, %81, %cst_35 [1] : vector<16x16xf32> to vector<16xf32>
    %83 = vector.shape_cast %82 : vector<16xf32> to vector<16x1xf32>
    %84 = vector.broadcast %83 : vector<16x1xf32> to vector<16x16xf32>
    %85 = arith.subf %81, %84 : vector<16x16xf32>
    %86 = math.exp %85 : vector<16x16xf32>
    %cst_36 = arith.constant dense<0.000000e+00> : vector<16xf32>
    %87 = vector.multi_reduction <add>, %86, %cst_36 [1] : vector<16x16xf32> to vector<16xf32>
    %88 = vector.shape_cast %87 : vector<16xf32> to vector<16x1xf32>
    %89 = tpu.reciprocal %88 {approx = true} : vector<16x1xf32> -> vector<16x1xf32>
    %90 = vector.broadcast %89 : vector<16x1xf32> to vector<16x16xf32>
    %91 = arith.mulf %86, %90 : vector<16x16xf32>
    %92 = arith.truncf %91 : vector<16x16xf32> to vector<16x16xbf16>
    %cst_37 = arith.constant dense<0.000000e+00> : vector<16x32xf32>
    %93 = tpu.matmul %92, %78, %cst_37 {dimension_numbers = #tpu.dot_dimension_numbers<[1], [0], [0], [1], [0, 0, 1, 1], [], []>} : vector<16x16xbf16>, vector<16x32xbf16>, vector<16x32xf32> -> vector<16x32xf32>
    %94 = arith.truncf %93 : vector<16x32xf32> to vector<16x32xbf16>
    %c0_38 = arith.constant 0 : index
    %c32 = arith.constant 32 : index
    %c0_39 = arith.constant 0 : index
    %95 = vector.load %arg8[%c0_38, %c32, %c0_39] : memref<2x64x64xbf16, #tpu.memory_space<vmem>>, vector<1x32x64xbf16>
    %96 = vector.shape_cast %95 : vector<1x32x64xbf16> to vector<32x64xbf16>
    %cst_40 = arith.constant dense<0.000000e+00> : vector<16x64xf32>
    %97 = tpu.matmul %94, %96, %cst_40 {dimension_numbers = #tpu.dot_dimension_numbers<[1], [0], [0], [1], [0, 0, 1, 1], [], []>} : vector<16x32xbf16>, vector<32x64xbf16>, vector<16x64xf32> -> vector<16x64xf32>
    %98 = arith.addf %72, %97 : vector<16x64xf32>
    %c0_41 = arith.constant 0 : index
    %c0_42 = arith.constant 0 : index
    %c0_43 = arith.constant 0 : index
    %99 = vector.load %arg11[%c0_41, %c0_42, %c0_43] : memref<2x8x64xf32, #tpu.memory_space<vmem>>, vector<1x1x64xf32>
    %100 = vector.shape_cast %99 : vector<1x1x64xf32> to vector<1x64xf32>
    %101 = vector.broadcast %100 : vector<1x64xf32> to vector<16x64xf32>
    %102 = arith.addf %98, %101 : vector<16x64xf32>
    %103 = arith.addf %37, %102 : vector<16x64xf32>
    %c0_44 = arith.constant 0 : index
    %c1_45 = arith.constant 1 : index
    %c0_46 = arith.constant 0 : index
    %104 = vector.load %arg11[%c0_44, %c1_45, %c0_46] : memref<2x8x64xf32, #tpu.memory_space<vmem>>, vector<1x1x64xf32>
    %105 = vector.shape_cast %104 : vector<1x1x64xf32> to vector<1x64xf32>
    %c0_47 = arith.constant 0 : index
    %c2_48 = arith.constant 2 : index
    %c0_49 = arith.constant 0 : index
    %106 = vector.load %arg11[%c0_47, %c2_48, %c0_49] : memref<2x8x64xf32, #tpu.memory_space<vmem>>, vector<1x1x64xf32>
    %107 = vector.shape_cast %106 : vector<1x1x64xf32> to vector<1x64xf32>
    %cst_50 = arith.constant dense<0.000000e+00> : vector<16xf32>
    %108 = vector.multi_reduction <add>, %103, %cst_50 [1] : vector<16x64xf32> to vector<16xf32>
    %109 = vector.shape_cast %108 : vector<16xf32> to vector<16x1xf32>
    %cst_51 = arith.constant 6.400000e+01 : f32
    %110 = vector.broadcast %cst_51 : f32 to vector<16x1xf32>
    %111 = arith.divf %109, %110 : vector<16x1xf32>
    %112 = vector.broadcast %111 : vector<16x1xf32> to vector<16x64xf32>
    %113 = arith.subf %103, %112 : vector<16x64xf32>
    %114 = arith.mulf %113, %113 : vector<16x64xf32>
    %cst_52 = arith.constant dense<0.000000e+00> : vector<16xf32>
    %115 = vector.multi_reduction <add>, %114, %cst_52 [1] : vector<16x64xf32> to vector<16xf32>
    %116 = vector.shape_cast %115 : vector<16xf32> to vector<16x1xf32>
    %cst_53 = arith.constant 6.400000e+01 : f32
    %117 = vector.broadcast %cst_53 : f32 to vector<16x1xf32>
    %118 = arith.divf %116, %117 : vector<16x1xf32>
    %119 = vector.broadcast %111 : vector<16x1xf32> to vector<16x64xf32>
    %120 = arith.subf %103, %119 : vector<16x64xf32>
    %cst_54 = arith.constant 9.99999996E-13 : f32
    %121 = vector.broadcast %cst_54 : f32 to vector<16x1xf32>
    %122 = arith.addf %118, %121 : vector<16x1xf32>
    %123 = math.rsqrt %122 : vector<16x1xf32>
    %124 = vector.broadcast %123 : vector<16x1xf32> to vector<16x64xf32>
    %125 = arith.mulf %120, %124 : vector<16x64xf32>
    %126 = vector.broadcast %105 : vector<1x64xf32> to vector<16x64xf32>
    %127 = arith.mulf %125, %126 : vector<16x64xf32>
    %128 = vector.broadcast %107 : vector<1x64xf32> to vector<16x64xf32>
    %129 = arith.addf %127, %128 : vector<16x64xf32>
    %130 = arith.truncf %129 : vector<16x64xf32> to vector<16x64xbf16>
    %c0_55 = arith.constant 0 : index
    %c0_56 = arith.constant 0 : index
    %c0_57 = arith.constant 0 : index
    %131 = vector.load %arg9[%c0_55, %c0_56, %c0_57] : memref<2x64x128xbf16, #tpu.memory_space<vmem>>, vector<1x64x128xbf16>
    %132 = vector.shape_cast %131 : vector<1x64x128xbf16> to vector<64x128xbf16>
    %cst_58 = arith.constant dense<0.000000e+00> : vector<16x128xf32>
    %133 = tpu.matmul %130, %132, %cst_58 {dimension_numbers = #tpu.dot_dimension_numbers<[1], [0], [0], [1], [0, 0, 1, 1], [], []>} : vector<16x64xbf16>, vector<64x128xbf16>, vector<16x128xf32> -> vector<16x128xf32>
    %c0_59 = arith.constant 0 : index
    %c0_60 = arith.constant 0 : index
    %c0_61 = arith.constant 0 : index
    %134 = vector.load %arg12[%c0_59, %c0_60, %c0_61] : memref<2x1x128xf32, #tpu.memory_space<vmem>>, vector<1x1x128xf32>
    %135 = vector.shape_cast %134 : vector<1x1x128xf32> to vector<1x128xf32>
    %136 = vector.broadcast %135 : vector<1x128xf32> to vector<16x128xf32>
    %137 = arith.addf %133, %136 : vector<16x128xf32>
    %cst_62 = arith.constant 5.000000e-01 : f32
    %138 = vector.broadcast %cst_62 : f32 to vector<16x128xf32>
    %139 = arith.mulf %138, %137 : vector<16x128xf32>
    %cst_63 = arith.constant 4.471500e-02 : f32
    %140 = vector.broadcast %cst_63 : f32 to vector<16x128xf32>
    %141 = arith.mulf %140, %137 : vector<16x128xf32>
    %142 = arith.mulf %141, %137 : vector<16x128xf32>
    %143 = arith.mulf %142, %137 : vector<16x128xf32>
    %144 = arith.addf %137, %143 : vector<16x128xf32>
    %cst_64 = arith.constant 0.797884583 : f32
    %145 = vector.broadcast %cst_64 : f32 to vector<16x128xf32>
    %146 = arith.mulf %145, %144 : vector<16x128xf32>
    %147 = math.tanh %146 : vector<16x128xf32>
    %cst_65 = arith.constant 1.000000e+00 : f32
    %148 = vector.broadcast %cst_65 : f32 to vector<16x128xf32>
    %149 = arith.addf %148, %147 : vector<16x128xf32>
    %150 = arith.mulf %139, %149 : vector<16x128xf32>
    %151 = arith.truncf %150 : vector<16x128xf32> to vector<16x128xbf16>
    %c0_66 = arith.constant 0 : index
    %c0_67 = arith.constant 0 : index
    %c0_68 = arith.constant 0 : index
    %152 = vector.load %arg10[%c0_66, %c0_67, %c0_68] : memref<2x128x64xbf16, #tpu.memory_space<vmem>>, vector<1x128x64xbf16>
    %153 = vector.shape_cast %152 : vector<1x128x64xbf16> to vector<128x64xbf16>
    %cst_69 = arith.constant dense<0.000000e+00> : vector<16x64xf32>
    %154 = tpu.matmul %151, %153, %cst_69 {dimension_numbers = #tpu.dot_dimension_numbers<[1], [0], [0], [1], [0, 0, 1, 1], [], []>} : vector<16x128xbf16>, vector<128x64xbf16>, vector<16x64xf32> -> vector<16x64xf32>
    %c0_70 = arith.constant 0 : index
    %c3 = arith.constant 3 : index
    %c0_71 = arith.constant 0 : index
    %155 = vector.load %arg11[%c0_70, %c3, %c0_71] : memref<2x8x64xf32, #tpu.memory_space<vmem>>, vector<1x1x64xf32>
    %156 = vector.shape_cast %155 : vector<1x1x64xf32> to vector<1x64xf32>
    %157 = vector.broadcast %156 : vector<1x64xf32> to vector<16x64xf32>
    %158 = arith.addf %154, %157 : vector<16x64xf32>
    %159 = arith.addf %129, %158 : vector<16x64xf32>
    %c0_72 = arith.constant 0 : index
    %c4 = arith.constant 4 : index
    %c0_73 = arith.constant 0 : index
    %160 = vector.load %arg11[%c0_72, %c4, %c0_73] : memref<2x8x64xf32, #tpu.memory_space<vmem>>, vector<1x1x64xf32>
    %161 = vector.shape_cast %160 : vector<1x1x64xf32> to vector<1x64xf32>
    %c0_74 = arith.constant 0 : index
    %c5 = arith.constant 5 : index
    %c0_75 = arith.constant 0 : index
    %162 = vector.load %arg11[%c0_74, %c5, %c0_75] : memref<2x8x64xf32, #tpu.memory_space<vmem>>, vector<1x1x64xf32>
    %163 = vector.shape_cast %162 : vector<1x1x64xf32> to vector<1x64xf32>
    %cst_76 = arith.constant dense<0.000000e+00> : vector<16xf32>
    %164 = vector.multi_reduction <add>, %159, %cst_76 [1] : vector<16x64xf32> to vector<16xf32>
    %165 = vector.shape_cast %164 : vector<16xf32> to vector<16x1xf32>
    %cst_77 = arith.constant 6.400000e+01 : f32
    %166 = vector.broadcast %cst_77 : f32 to vector<16x1xf32>
    %167 = arith.divf %165, %166 : vector<16x1xf32>
    %168 = vector.broadcast %167 : vector<16x1xf32> to vector<16x64xf32>
    %169 = arith.subf %159, %168 : vector<16x64xf32>
    %170 = arith.mulf %169, %169 : vector<16x64xf32>
    %cst_78 = arith.constant dense<0.000000e+00> : vector<16xf32>
    %171 = vector.multi_reduction <add>, %170, %cst_78 [1] : vector<16x64xf32> to vector<16xf32>
    %172 = vector.shape_cast %171 : vector<16xf32> to vector<16x1xf32>
    %cst_79 = arith.constant 6.400000e+01 : f32
    %173 = vector.broadcast %cst_79 : f32 to vector<16x1xf32>
    %174 = arith.divf %172, %173 : vector<16x1xf32>
    %175 = vector.broadcast %167 : vector<16x1xf32> to vector<16x64xf32>
    %176 = arith.subf %159, %175 : vector<16x64xf32>
    %cst_80 = arith.constant 9.99999996E-13 : f32
    %177 = vector.broadcast %cst_80 : f32 to vector<16x1xf32>
    %178 = arith.addf %174, %177 : vector<16x1xf32>
    %179 = math.rsqrt %178 : vector<16x1xf32>
    %180 = vector.broadcast %179 : vector<16x1xf32> to vector<16x64xf32>
    %181 = arith.mulf %176, %180 : vector<16x64xf32>
    %182 = vector.broadcast %161 : vector<1x64xf32> to vector<16x64xf32>
    %183 = arith.mulf %181, %182 : vector<16x64xf32>
    %184 = vector.broadcast %163 : vector<1x64xf32> to vector<16x64xf32>
    %185 = arith.addf %183, %184 : vector<16x64xf32>
    %186 = arith.truncf %185 : vector<16x64xf32> to vector<16x64xbf16>
    %c1_81 = arith.constant 1 : index
    %c0_82 = arith.constant 0 : index
    %c0_83 = arith.constant 0 : index
    %187 = vector.load %arg6[%c1_81, %c0_82, %c0_83] : memref<2x64x192xbf16, #tpu.memory_space<vmem>>, vector<1x64x192xbf16>
    %188 = vector.shape_cast %187 : vector<1x64x192xbf16> to vector<64x192xbf16>
    %cst_84 = arith.constant dense<0.000000e+00> : vector<16x192xf32>
    %189 = tpu.matmul %186, %188, %cst_84 {dimension_numbers = #tpu.dot_dimension_numbers<[1], [0], [0], [1], [0, 0, 1, 1], [], []>} : vector<16x64xbf16>, vector<64x192xbf16>, vector<16x192xf32> -> vector<16x192xf32>
    %c1_85 = arith.constant 1 : index
    %c0_86 = arith.constant 0 : index
    %c0_87 = arith.constant 0 : index
    %190 = vector.load %arg7[%c1_85, %c0_86, %c0_87] : memref<2x1x192xf32, #tpu.memory_space<vmem>>, vector<1x1x192xf32>
    %191 = vector.shape_cast %190 : vector<1x1x192xf32> to vector<1x192xf32>
    %192 = vector.broadcast %191 : vector<1x192xf32> to vector<16x192xf32>
    %193 = arith.addf %189, %192 : vector<16x192xf32>
    %194 = vector.extract_strided_slice %193 {offsets = [0, 0], sizes = [16, 32], strides = [1, 1]} : vector<16x192xf32> to vector<16x32xf32>
    %195 = arith.truncf %194 : vector<16x32xf32> to vector<16x32xbf16>
    %196 = vector.extract_strided_slice %193 {offsets = [0, 64], sizes = [16, 32], strides = [1, 1]} : vector<16x192xf32> to vector<16x32xf32>
    %197 = arith.truncf %196 : vector<16x32xf32> to vector<16x32xbf16>
    %198 = vector.extract_strided_slice %193 {offsets = [0, 128], sizes = [16, 32], strides = [1, 1]} : vector<16x192xf32> to vector<16x32xf32>
    %199 = arith.truncf %198 : vector<16x32xf32> to vector<16x32xbf16>
    %cst_88 = arith.constant dense<0.000000e+00> : vector<16x16xf32>
    %200 = tpu.matmul %195, %197, %cst_88 {dimension_numbers = #tpu.dot_dimension_numbers<[1], [1], [0], [0], [0, 0, 1, 0], [], []>} : vector<16x32xbf16>, vector<16x32xbf16>, vector<16x16xf32> -> vector<16x16xf32>
    %201 = vector.broadcast %39 : vector<1x16xf32> to vector<16x16xf32>
    %202 = arith.addf %200, %201 : vector<16x16xf32>
    %cst_89 = arith.constant dense<0xFF800000> : vector<16xf32>
    %203 = vector.multi_reduction <maximumf>, %202, %cst_89 [1] : vector<16x16xf32> to vector<16xf32>
    %204 = vector.shape_cast %203 : vector<16xf32> to vector<16x1xf32>
    %205 = vector.broadcast %204 : vector<16x1xf32> to vector<16x16xf32>
    %206 = arith.subf %202, %205 : vector<16x16xf32>
    %207 = math.exp %206 : vector<16x16xf32>
    %cst_90 = arith.constant dense<0.000000e+00> : vector<16xf32>
    %208 = vector.multi_reduction <add>, %207, %cst_90 [1] : vector<16x16xf32> to vector<16xf32>
    %209 = vector.shape_cast %208 : vector<16xf32> to vector<16x1xf32>
    %210 = tpu.reciprocal %209 {approx = true} : vector<16x1xf32> -> vector<16x1xf32>
    %211 = vector.broadcast %210 : vector<16x1xf32> to vector<16x16xf32>
    %212 = arith.mulf %207, %211 : vector<16x16xf32>
    %213 = arith.truncf %212 : vector<16x16xf32> to vector<16x16xbf16>
    %cst_91 = arith.constant dense<0.000000e+00> : vector<16x32xf32>
    %214 = tpu.matmul %213, %199, %cst_91 {dimension_numbers = #tpu.dot_dimension_numbers<[1], [0], [0], [1], [0, 0, 1, 1], [], []>} : vector<16x16xbf16>, vector<16x32xbf16>, vector<16x32xf32> -> vector<16x32xf32>
    %215 = arith.truncf %214 : vector<16x32xf32> to vector<16x32xbf16>
    %c1_92 = arith.constant 1 : index
    %c0_93 = arith.constant 0 : index
    %c0_94 = arith.constant 0 : index
    %216 = vector.load %arg8[%c1_92, %c0_93, %c0_94] : memref<2x64x64xbf16, #tpu.memory_space<vmem>>, vector<1x32x64xbf16>
    %217 = vector.shape_cast %216 : vector<1x32x64xbf16> to vector<32x64xbf16>
    %cst_95 = arith.constant dense<0.000000e+00> : vector<16x64xf32>
    %218 = tpu.matmul %215, %217, %cst_95 {dimension_numbers = #tpu.dot_dimension_numbers<[1], [0], [0], [1], [0, 0, 1, 1], [], []>} : vector<16x32xbf16>, vector<32x64xbf16>, vector<16x64xf32> -> vector<16x64xf32>
    %219 = vector.extract_strided_slice %193 {offsets = [0, 32], sizes = [16, 32], strides = [1, 1]} : vector<16x192xf32> to vector<16x32xf32>
    %220 = arith.truncf %219 : vector<16x32xf32> to vector<16x32xbf16>
    %221 = vector.extract_strided_slice %193 {offsets = [0, 96], sizes = [16, 32], strides = [1, 1]} : vector<16x192xf32> to vector<16x32xf32>
    %222 = arith.truncf %221 : vector<16x32xf32> to vector<16x32xbf16>
    %223 = vector.extract_strided_slice %193 {offsets = [0, 160], sizes = [16, 32], strides = [1, 1]} : vector<16x192xf32> to vector<16x32xf32>
    %224 = arith.truncf %223 : vector<16x32xf32> to vector<16x32xbf16>
    %cst_96 = arith.constant dense<0.000000e+00> : vector<16x16xf32>
    %225 = tpu.matmul %220, %222, %cst_96 {dimension_numbers = #tpu.dot_dimension_numbers<[1], [1], [0], [0], [0, 0, 1, 0], [], []>} : vector<16x32xbf16>, vector<16x32xbf16>, vector<16x16xf32> -> vector<16x16xf32>
    %226 = vector.broadcast %39 : vector<1x16xf32> to vector<16x16xf32>
    %227 = arith.addf %225, %226 : vector<16x16xf32>
    %cst_97 = arith.constant dense<0xFF800000> : vector<16xf32>
    %228 = vector.multi_reduction <maximumf>, %227, %cst_97 [1] : vector<16x16xf32> to vector<16xf32>
    %229 = vector.shape_cast %228 : vector<16xf32> to vector<16x1xf32>
    %230 = vector.broadcast %229 : vector<16x1xf32> to vector<16x16xf32>
    %231 = arith.subf %227, %230 : vector<16x16xf32>
    %232 = math.exp %231 : vector<16x16xf32>
    %cst_98 = arith.constant dense<0.000000e+00> : vector<16xf32>
    %233 = vector.multi_reduction <add>, %232, %cst_98 [1] : vector<16x16xf32> to vector<16xf32>
    %234 = vector.shape_cast %233 : vector<16xf32> to vector<16x1xf32>
    %235 = tpu.reciprocal %234 {approx = true} : vector<16x1xf32> -> vector<16x1xf32>
    %236 = vector.broadcast %235 : vector<16x1xf32> to vector<16x16xf32>
    %237 = arith.mulf %232, %236 : vector<16x16xf32>
    %238 = arith.truncf %237 : vector<16x16xf32> to vector<16x16xbf16>
    %cst_99 = arith.constant dense<0.000000e+00> : vector<16x32xf32>
    %239 = tpu.matmul %238, %224, %cst_99 {dimension_numbers = #tpu.dot_dimension_numbers<[1], [0], [0], [1], [0, 0, 1, 1], [], []>} : vector<16x16xbf16>, vector<16x32xbf16>, vector<16x32xf32> -> vector<16x32xf32>
    %240 = arith.truncf %239 : vector<16x32xf32> to vector<16x32xbf16>
    %c1_100 = arith.constant 1 : index
    %c32_101 = arith.constant 32 : index
    %c0_102 = arith.constant 0 : index
    %241 = vector.load %arg8[%c1_100, %c32_101, %c0_102] : memref<2x64x64xbf16, #tpu.memory_space<vmem>>, vector<1x32x64xbf16>
    %242 = vector.shape_cast %241 : vector<1x32x64xbf16> to vector<32x64xbf16>
    %cst_103 = arith.constant dense<0.000000e+00> : vector<16x64xf32>
    %243 = tpu.matmul %240, %242, %cst_103 {dimension_numbers = #tpu.dot_dimension_numbers<[1], [0], [0], [1], [0, 0, 1, 1], [], []>} : vector<16x32xbf16>, vector<32x64xbf16>, vector<16x64xf32> -> vector<16x64xf32>
    %244 = arith.addf %218, %243 : vector<16x64xf32>
    %c1_104 = arith.constant 1 : index
    %c0_105 = arith.constant 0 : index
    %c0_106 = arith.constant 0 : index
    %245 = vector.load %arg11[%c1_104, %c0_105, %c0_106] : memref<2x8x64xf32, #tpu.memory_space<vmem>>, vector<1x1x64xf32>
    %246 = vector.shape_cast %245 : vector<1x1x64xf32> to vector<1x64xf32>
    %247 = vector.broadcast %246 : vector<1x64xf32> to vector<16x64xf32>
    %248 = arith.addf %244, %247 : vector<16x64xf32>
    %249 = arith.addf %185, %248 : vector<16x64xf32>
    %c1_107 = arith.constant 1 : index
    %c1_108 = arith.constant 1 : index
    %c0_109 = arith.constant 0 : index
    %250 = vector.load %arg11[%c1_107, %c1_108, %c0_109] : memref<2x8x64xf32, #tpu.memory_space<vmem>>, vector<1x1x64xf32>
    %251 = vector.shape_cast %250 : vector<1x1x64xf32> to vector<1x64xf32>
    %c1_110 = arith.constant 1 : index
    %c2_111 = arith.constant 2 : index
    %c0_112 = arith.constant 0 : index
    %252 = vector.load %arg11[%c1_110, %c2_111, %c0_112] : memref<2x8x64xf32, #tpu.memory_space<vmem>>, vector<1x1x64xf32>
    %253 = vector.shape_cast %252 : vector<1x1x64xf32> to vector<1x64xf32>
    %cst_113 = arith.constant dense<0.000000e+00> : vector<16xf32>
    %254 = vector.multi_reduction <add>, %249, %cst_113 [1] : vector<16x64xf32> to vector<16xf32>
    %255 = vector.shape_cast %254 : vector<16xf32> to vector<16x1xf32>
    %cst_114 = arith.constant 6.400000e+01 : f32
    %256 = vector.broadcast %cst_114 : f32 to vector<16x1xf32>
    %257 = arith.divf %255, %256 : vector<16x1xf32>
    %258 = vector.broadcast %257 : vector<16x1xf32> to vector<16x64xf32>
    %259 = arith.subf %249, %258 : vector<16x64xf32>
    %260 = arith.mulf %259, %259 : vector<16x64xf32>
    %cst_115 = arith.constant dense<0.000000e+00> : vector<16xf32>
    %261 = vector.multi_reduction <add>, %260, %cst_115 [1] : vector<16x64xf32> to vector<16xf32>
    %262 = vector.shape_cast %261 : vector<16xf32> to vector<16x1xf32>
    %cst_116 = arith.constant 6.400000e+01 : f32
    %263 = vector.broadcast %cst_116 : f32 to vector<16x1xf32>
    %264 = arith.divf %262, %263 : vector<16x1xf32>
    %265 = vector.broadcast %257 : vector<16x1xf32> to vector<16x64xf32>
    %266 = arith.subf %249, %265 : vector<16x64xf32>
    %cst_117 = arith.constant 9.99999996E-13 : f32
    %267 = vector.broadcast %cst_117 : f32 to vector<16x1xf32>
    %268 = arith.addf %264, %267 : vector<16x1xf32>
    %269 = math.rsqrt %268 : vector<16x1xf32>
    %270 = vector.broadcast %269 : vector<16x1xf32> to vector<16x64xf32>
    %271 = arith.mulf %266, %270 : vector<16x64xf32>
    %272 = vector.broadcast %251 : vector<1x64xf32> to vector<16x64xf32>
    %273 = arith.mulf %271, %272 : vector<16x64xf32>
    %274 = vector.broadcast %253 : vector<1x64xf32> to vector<16x64xf32>
    %275 = arith.addf %273, %274 : vector<16x64xf32>
    %276 = arith.truncf %275 : vector<16x64xf32> to vector<16x64xbf16>
    %c1_118 = arith.constant 1 : index
    %c0_119 = arith.constant 0 : index
    %c0_120 = arith.constant 0 : index
    %277 = vector.load %arg9[%c1_118, %c0_119, %c0_120] : memref<2x64x128xbf16, #tpu.memory_space<vmem>>, vector<1x64x128xbf16>
    %278 = vector.shape_cast %277 : vector<1x64x128xbf16> to vector<64x128xbf16>
    %cst_121 = arith.constant dense<0.000000e+00> : vector<16x128xf32>
    %279 = tpu.matmul %276, %278, %cst_121 {dimension_numbers = #tpu.dot_dimension_numbers<[1], [0], [0], [1], [0, 0, 1, 1], [], []>} : vector<16x64xbf16>, vector<64x128xbf16>, vector<16x128xf32> -> vector<16x128xf32>
    %c1_122 = arith.constant 1 : index
    %c0_123 = arith.constant 0 : index
    %c0_124 = arith.constant 0 : index
    %280 = vector.load %arg12[%c1_122, %c0_123, %c0_124] : memref<2x1x128xf32, #tpu.memory_space<vmem>>, vector<1x1x128xf32>
    %281 = vector.shape_cast %280 : vector<1x1x128xf32> to vector<1x128xf32>
    %282 = vector.broadcast %281 : vector<1x128xf32> to vector<16x128xf32>
    %283 = arith.addf %279, %282 : vector<16x128xf32>
    %cst_125 = arith.constant 5.000000e-01 : f32
    %284 = vector.broadcast %cst_125 : f32 to vector<16x128xf32>
    %285 = arith.mulf %284, %283 : vector<16x128xf32>
    %cst_126 = arith.constant 4.471500e-02 : f32
    %286 = vector.broadcast %cst_126 : f32 to vector<16x128xf32>
    %287 = arith.mulf %286, %283 : vector<16x128xf32>
    %288 = arith.mulf %287, %283 : vector<16x128xf32>
    %289 = arith.mulf %288, %283 : vector<16x128xf32>
    %290 = arith.addf %283, %289 : vector<16x128xf32>
    %cst_127 = arith.constant 0.797884583 : f32
    %291 = vector.broadcast %cst_127 : f32 to vector<16x128xf32>
    %292 = arith.mulf %291, %290 : vector<16x128xf32>
    %293 = math.tanh %292 : vector<16x128xf32>
    %cst_128 = arith.constant 1.000000e+00 : f32
    %294 = vector.broadcast %cst_128 : f32 to vector<16x128xf32>
    %295 = arith.addf %294, %293 : vector<16x128xf32>
    %296 = arith.mulf %285, %295 : vector<16x128xf32>
    %297 = arith.truncf %296 : vector<16x128xf32> to vector<16x128xbf16>
    %c1_129 = arith.constant 1 : index
    %c0_130 = arith.constant 0 : index
    %c0_131 = arith.constant 0 : index
    %298 = vector.load %arg10[%c1_129, %c0_130, %c0_131] : memref<2x128x64xbf16, #tpu.memory_space<vmem>>, vector<1x128x64xbf16>
    %299 = vector.shape_cast %298 : vector<1x128x64xbf16> to vector<128x64xbf16>
    %cst_132 = arith.constant dense<0.000000e+00> : vector<16x64xf32>
    %300 = tpu.matmul %297, %299, %cst_132 {dimension_numbers = #tpu.dot_dimension_numbers<[1], [0], [0], [1], [0, 0, 1, 1], [], []>} : vector<16x128xbf16>, vector<128x64xbf16>, vector<16x64xf32> -> vector<16x64xf32>
    %c1_133 = arith.constant 1 : index
    %c3_134 = arith.constant 3 : index
    %c0_135 = arith.constant 0 : index
    %301 = vector.load %arg11[%c1_133, %c3_134, %c0_135] : memref<2x8x64xf32, #tpu.memory_space<vmem>>, vector<1x1x64xf32>
    %302 = vector.shape_cast %301 : vector<1x1x64xf32> to vector<1x64xf32>
    %303 = vector.broadcast %302 : vector<1x64xf32> to vector<16x64xf32>
    %304 = arith.addf %300, %303 : vector<16x64xf32>
    %305 = arith.addf %275, %304 : vector<16x64xf32>
    %c1_136 = arith.constant 1 : index
    %c4_137 = arith.constant 4 : index
    %c0_138 = arith.constant 0 : index
    %306 = vector.load %arg11[%c1_136, %c4_137, %c0_138] : memref<2x8x64xf32, #tpu.memory_space<vmem>>, vector<1x1x64xf32>
    %307 = vector.shape_cast %306 : vector<1x1x64xf32> to vector<1x64xf32>
    %c1_139 = arith.constant 1 : index
    %c5_140 = arith.constant 5 : index
    %c0_141 = arith.constant 0 : index
    %308 = vector.load %arg11[%c1_139, %c5_140, %c0_141] : memref<2x8x64xf32, #tpu.memory_space<vmem>>, vector<1x1x64xf32>
    %309 = vector.shape_cast %308 : vector<1x1x64xf32> to vector<1x64xf32>
    %cst_142 = arith.constant dense<0.000000e+00> : vector<16xf32>
    %310 = vector.multi_reduction <add>, %305, %cst_142 [1] : vector<16x64xf32> to vector<16xf32>
    %311 = vector.shape_cast %310 : vector<16xf32> to vector<16x1xf32>
    %cst_143 = arith.constant 6.400000e+01 : f32
    %312 = vector.broadcast %cst_143 : f32 to vector<16x1xf32>
    %313 = arith.divf %311, %312 : vector<16x1xf32>
    %314 = vector.broadcast %313 : vector<16x1xf32> to vector<16x64xf32>
    %315 = arith.subf %305, %314 : vector<16x64xf32>
    %316 = arith.mulf %315, %315 : vector<16x64xf32>
    %cst_144 = arith.constant dense<0.000000e+00> : vector<16xf32>
    %317 = vector.multi_reduction <add>, %316, %cst_144 [1] : vector<16x64xf32> to vector<16xf32>
    %318 = vector.shape_cast %317 : vector<16xf32> to vector<16x1xf32>
    %cst_145 = arith.constant 6.400000e+01 : f32
    %319 = vector.broadcast %cst_145 : f32 to vector<16x1xf32>
    %320 = arith.divf %318, %319 : vector<16x1xf32>
    %321 = vector.broadcast %313 : vector<16x1xf32> to vector<16x64xf32>
    %322 = arith.subf %305, %321 : vector<16x64xf32>
    %cst_146 = arith.constant 9.99999996E-13 : f32
    %323 = vector.broadcast %cst_146 : f32 to vector<16x1xf32>
    %324 = arith.addf %320, %323 : vector<16x1xf32>
    %325 = math.rsqrt %324 : vector<16x1xf32>
    %326 = vector.broadcast %325 : vector<16x1xf32> to vector<16x64xf32>
    %327 = arith.mulf %322, %326 : vector<16x64xf32>
    %328 = vector.broadcast %307 : vector<1x64xf32> to vector<16x64xf32>
    %329 = arith.mulf %327, %328 : vector<16x64xf32>
    %330 = vector.broadcast %309 : vector<1x64xf32> to vector<16x64xf32>
    %331 = arith.addf %329, %330 : vector<16x64xf32>
    %332 = arith.truncf %331 : vector<16x64xf32> to vector<16x64xbf16>
    %c0_147 = arith.constant 0 : index
    %c0_148 = arith.constant 0 : index
    %333 = vector.load %arg13[%c0_147, %c0_148] : memref<64x128xbf16, #tpu.memory_space<vmem>>, vector<64x128xbf16>
    %cst_149 = arith.constant dense<0.000000e+00> : vector<16x128xf32>
    %334 = tpu.matmul %332, %333, %cst_149 {dimension_numbers = #tpu.dot_dimension_numbers<[1], [0], [0], [1], [0, 0, 1, 1], [], []>} : vector<16x64xbf16>, vector<64x128xbf16>, vector<16x128xf32> -> vector<16x128xf32>
    %c0_150 = arith.constant 0 : index
    %c0_151 = arith.constant 0 : index
    %335 = vector.load %arg14[%c0_150, %c0_151] : memref<1x128xf32, #tpu.memory_space<vmem>>, vector<1x128xf32>
    %336 = vector.broadcast %335 : vector<1x128xf32> to vector<16x128xf32>
    %337 = arith.addf %334, %336 : vector<16x128xf32>
    %cst_152 = arith.constant 5.000000e-01 : f32
    %338 = vector.broadcast %cst_152 : f32 to vector<16x1xf32>
    %339 = arith.cmpf ogt, %3, %338 : vector<16x1xf32>
    %c-100_i32 = arith.constant -100 : i32
    %340 = vector.broadcast %c-100_i32 : i32 to vector<16x1xi32>
    %341 = arith.select %339, %1, %340 : vector<16x1xi1>, vector<16x1xi32>
    %342 = tpu.iota {dimensions = array<i32: 1>} : vector<16x128xi32>
    %c9_i32 = arith.constant 9 : i32
    %343 = vector.broadcast %c9_i32 : i32 to vector<16x128xi32>
    %344 = arith.cmpi slt, %342, %343 : vector<16x128xi32>
    %cst_153 = arith.constant -1.000000e+09 : f32
    %345 = vector.broadcast %cst_153 : f32 to vector<16x128xf32>
    %346 = arith.select %344, %337, %345 : vector<16x128xi1>, vector<16x128xf32>
    %cst_154 = arith.constant dense<0xFF800000> : vector<16xf32>
    %347 = vector.multi_reduction <maximumf>, %346, %cst_154 [1] : vector<16x128xf32> to vector<16xf32>
    %348 = vector.shape_cast %347 : vector<16xf32> to vector<16x1xf32>
    %349 = vector.broadcast %348 : vector<16x1xf32> to vector<16x128xf32>
    %350 = arith.subf %346, %349 : vector<16x128xf32>
    %351 = math.exp %350 : vector<16x128xf32>
    %cst_155 = arith.constant dense<0.000000e+00> : vector<16xf32>
    %352 = vector.multi_reduction <add>, %351, %cst_155 [1] : vector<16x128xf32> to vector<16xf32>
    %353 = vector.shape_cast %352 : vector<16xf32> to vector<16x1xf32>
    %354 = math.log %353 : vector<16x1xf32>
    %355 = arith.addf %348, %354 : vector<16x1xf32>
    %356 = vector.broadcast %341 : vector<16x1xi32> to vector<16x128xi32>
    %357 = arith.cmpi eq, %342, %356 : vector<16x128xi32>
    %cst_156 = arith.constant 0.000000e+00 : f32
    %358 = vector.broadcast %cst_156 : f32 to vector<16x128xf32>
    %359 = arith.select %357, %337, %358 : vector<16x128xi1>, vector<16x128xf32>
    %cst_157 = arith.constant dense<0.000000e+00> : vector<16xf32>
    %360 = vector.multi_reduction <add>, %359, %cst_157 [1] : vector<16x128xf32> to vector<16xf32>
    %361 = vector.shape_cast %360 : vector<16xf32> to vector<16x1xf32>
    %c-100_i32_158 = arith.constant -100 : i32
    %362 = vector.broadcast %c-100_i32_158 : i32 to vector<16x1xi32>
    %363 = arith.cmpi ne, %341, %362 : vector<16x1xi32>
    %364 = arith.extui %363 : vector<16x1xi1> to vector<16x1xi32>
    %365 = arith.sitofp %364 : vector<16x1xi32> to vector<16x1xf32>
    %366 = arith.subf %355, %361 : vector<16x1xf32>
    %367 = arith.mulf %366, %365 : vector<16x1xf32>
    %c9_i32_159 = arith.constant 9 : i32
    %368 = vector.broadcast %c9_i32_159 : i32 to vector<16x128xi32>
    %369 = arith.cmpi eq, %342, %368 : vector<16x128xi32>
    %370 = vector.shape_cast %367 : vector<16x1xf32> to vector<16x1xf32>
    %371 = vector.broadcast %370 : vector<16x1xf32> to vector<16x128xf32>
    %372 = arith.select %369, %371, %337 : vector<16x128xi1>, vector<16x128xf32>
    %c10_i32 = arith.constant 10 : i32
    %373 = vector.broadcast %c10_i32 : i32 to vector<16x128xi32>
    %374 = arith.cmpi eq, %342, %373 : vector<16x128xi32>
    %375 = vector.shape_cast %365 : vector<16x1xf32> to vector<16x1xf32>
    %376 = vector.broadcast %375 : vector<16x1xf32> to vector<16x128xf32>
    %377 = arith.select %374, %376, %372 : vector<16x128xi1>, vector<16x128xf32>
    %c0_160 = arith.constant 0 : index
    %c0_161 = arith.constant 0 : index
    %378 = vector.load %arg15[%c0_160, %c0_161] : memref<16x128xf32, #tpu.memory_space<vmem>>, vector<16x128xf32>
    tpu.vector_store %arg15[%c0_160, %c0_161], %377 {strides = array<i32>} : memref<16x128xf32, #tpu.memory_space<vmem>>, vector<16x128xf32>,
    return
  }
  func.func @transform_0(%arg0: i32) -> (i32, i32) {
    %c0_i32 = arith.constant 0 : i32
    %c0_i32_0 = arith.constant 0 : i32
    return %arg0, %c0_i32 : i32, i32
  }
  func.func @transform_1(%arg0: i32) -> (i32, i32, i32) {
    %c0_i32 = arith.constant 0 : i32
    %c0_i32_0 = arith.constant 0 : i32
    %c0_i32_1 = arith.constant 0 : i32
    return %arg0, %c0_i32, %c0_i32_0 : i32, i32, i32
  }
  func.func @transform_2(%arg0: i32) -> (i32, i32) {
    %c0_i32 = arith.constant 0 : i32
    %c0_i32_0 = arith.constant 0 : i32
    %c0_i32_1 = arith.constant 0 : i32
    return %c0_i32, %c0_i32_0 : i32, i32
  }
  func.func @transform_3(%arg0: i32) -> (i32, i32) {
    %c0_i32 = arith.constant 0 : i32
    %c0_i32_0 = arith.constant 0 : i32
    %c0_i32_1 = arith.constant 0 : i32
    return %c0_i32, %c0_i32_0 : i32, i32
  }
  func.func @transform_4(%arg0: i32) -> (i32, i32) {
    %c0_i32 = arith.constant 0 : i32
    %c0_i32_0 = arith.constant 0 : i32
    %c0_i32_1 = arith.constant 0 : i32
    return %c0_i32, %c0_i32_0 : i32, i32
  }
  func.func @transform_5(%arg0: i32) -> (i32, i32, i32) {
    %c0_i32 = arith.constant 0 : i32
    %c0_i32_0 = arith.constant 0 : i32
    %c0_i32_1 = arith.constant 0 : i32
    %c0_i32_2 = arith.constant 0 : i32
    return %c0_i32, %c0_i32_0, %c0_i32_1 : i32, i32, i32
  }
  func.func @transform_6(%arg0: i32) -> (i32, i32, i32) {
    %c0_i32 = arith.constant 0 : i32
    %c0_i32_0 = arith.constant 0 : i32
    %c0_i32_1 = arith.constant 0 : i32
    %c0_i32_2 = arith.constant 0 : i32
    return %c0_i32, %c0_i32_0, %c0_i32_1 : i32, i32, i32
  }
  func.func @transform_7(%arg0: i32) -> (i32, i32, i32) {
    %c0_i32 = arith.constant 0 : i32
    %c0_i32_0 = arith.constant 0 : i32
    %c0_i32_1 = arith.constant 0 : i32
    %c0_i32_2 = arith.constant 0 : i32
    return %c0_i32, %c0_i32_0, %c0_i32_1 : i32, i32, i32
  }
  func.func @transform_8(%arg0: i32) -> (i32, i32, i32) {
    %c0_i32 = arith.constant 0 : i32
    %c0_i32_0 = arith.constant 0 : i32
    %c0_i32_1 = arith.constant 0 : i32
    %c0_i32_2 = arith.constant 0 : i32
    return %c0_i32, %c0_i32_0, %c0_i32_1 : i32, i32, i32
  }
  func.func @transform_9(%arg0: i32) -> (i32, i32, i32) {
    %c0_i32 = arith.constant 0 : i32
    %c0_i32_0 = arith.constant 0 : i32
    %c0_i32_1 = arith.constant 0 : i32
    %c0_i32_2 = arith.constant 0 : i32
    return %c0_i32, %c0_i32_0, %c0_i32_1 : i32, i32, i32
  }
  func.func @transform_10(%arg0: i32) -> (i32, i32, i32) {
    %c0_i32 = arith.constant 0 : i32
    %c0_i32_0 = arith.constant 0 : i32
    %c0_i32_1 = arith.constant 0 : i32
    %c0_i32_2 = arith.constant 0 : i32
    return %c0_i32, %c0_i32_0, %c0_i32_1 : i32, i32, i32
  }
  func.func @transform_11(%arg0: i32) -> (i32, i32, i32) {
    %c0_i32 = arith.constant 0 : i32
    %c0_i32_0 = arith.constant 0 : i32
    %c0_i32_1 = arith.constant 0 : i32
    %c0_i32_2 = arith.constant 0 : i32
    return %c0_i32, %c0_i32_0, %c0_i32_1 : i32, i32, i32
  }
  func.func @transform_12(%arg0: i32) -> (i32, i32) {
    %c0_i32 = arith.constant 0 : i32
    %c0_i32_0 = arith.constant 0 : i32
    %c0_i32_1 = arith.constant 0 : i32
    return %c0_i32, %c0_i32_0 : i32, i32
  }
  func.func @transform_13(%arg0: i32) -> (i32, i32) {
    %c0_i32 = arith.constant 0 : i32
    %c0_i32_0 = arith.constant 0 : i32
    %c0_i32_1 = arith.constant 0 : i32
    return %c0_i32, %c0_i32_0 : i32, i32
  }
  func.func @transform_14(%arg0: i32) -> (i32, i32) {
    %c0_i32 = arith.constant 0 : i32
    %c0_i32_0 = arith.constant 0 : i32
    return %arg0, %c0_i32 : i32, i32
  }
}

</mosaic_0001>

<bundles_post_ra>
// kernel: equipment_ner_forward.1
= control target key start
LH: loop header
LB: loop body
LE: loop exit
PB: predicated region body
PF: predicated region fallthrough
CT: control target
= control target key end

     0   :  { %19 = vsyncpa [#allocation3], 0  ;;  %s3169_s0 = inlined_call_operand.vmem [shape: s32[32,3], index: 0, kind: input, shape index: {}]   ;;  %s3170_s1 = inlined_call_operand.vmem [shape: f32[2,1,16], index: 1, kind: input, shape index: {}]   ;;  %s3171_s2 = inlined_call_operand.vmem [shape: f32[32,64], index: 2, kind: input, shape index: {}]   ;;  %s3172_s3 = inlined_call_operand.vmem [shape: bf16[128,64], index: 3, kind: input, shape index: {}]   ;;  %s3173_s4 = inlined_call_operand.vmem [shape: f32[2,64], index: 4, kind: input, shape index: {}]   ;;  %s3174_s5 = inlined_call_operand.vmem [shape: bf16[2,64,192], index: 5, kind: input, shape index: {}]   ;;  %s3175_s6 = inlined_call_operand.vmem [shape: f32[2,1,192], index: 6, kind: input, shape index: {}]   ;;  %s3176_s7 = inlined_call_operand.vmem [shape: bf16[2,64,64], index: 7, kind: input, shape index: {}]   ;;  %s3177_s8 = inlined_call_operand.hbm [shape: bf16[2,64,128], index: 8, kind: input, shape index: {}]   ;;  %s3178_s9 = inlined_call_operand.vmem [shape: bf16[2,128,64], index: 9, kind: input, shape index: {}]   ;;  %s3179_s10 = inlined_call_operand.vmem [shape: f32[2,8,64], index: 10, kind: input, shape index: {}]   ;;  %s3180_s11 = inlined_call_operand.vmem [shape: f32[2,1,128], index: 11, kind: input, shape index: {}]   ;;  %s3181_s12 = inlined_call_operand.hbm [shape: bf16[64,128], index: 12, kind: input, shape index: {}]   ;;  %s3182_s13 = inlined_call_operand.vmem [shape: f32[1,128], index: 13, kind: input, shape index: {}]   ;;  %s3183_s14 = inlined_call_operand.vmem [shape: f32[32,128], index: 14, kind: output, shape index: {}]  }
   0x1   :  { %20 = vsyncpa [#allocation5], 0  ;;  %s2703_s29 = smov 0  }
   0x2 LB: > { %s390_s16 = sshll.u32 %s3177_s8, 4  ;;  %s2712_s17 = sadd.s32 4294967295, %s2613_s29   ;;  %s2613_s29 = sphi %s2703_s29, %s26_s29   ;;  %s391_s16 = int_to_ptr.hbm [resolvable:$true] %s390_s16 }
   0x3   : > { %p2022_p0 = scmp.ge.s32.totalorder %s2613_s29, 1  ;;  %p361_p1 = scmp.lt.s32.totalorder %s2613_s29, 3 }
   0x4   : > { %p2415_p2 = scmp.eq.s32.totalorder %s2712_s17, 0  ;;  %s2615_s19 = smov [#allocation2]  }
   0x5   : > { %p2717_p3 = pnand %p2022_p0, %p361_p1  ;;  %s392_s20 = sshll.u32 %s2615_s19, 4  ;;  %s393_s20 = int_to_ptr.vmem [resolvable:$true] %s392_s20 }
   0x6   : > { %s413_s23 = sshll.u32 %s3181_s12, 4  ;;  %s2616_s24 = smov [#allocation4]   ;;  %s414_s23 = int_to_ptr.hbm [resolvable:$true] %s413_s23 }
   0x7   : > { %p2408_p4 = pneg %p2717_p3  ;;  %s415_s25 = sshll.u32 %s2616_s24, 4  ;;  %s416_s25 = int_to_ptr.vmem [resolvable:$true] %s415_s25 }
   0x8   : > { %s2617_s26 = smov 64   ;;  %s2618_s27 = smov 4  }
   0x9   : > { %p2409_p5 = pnand %p2415_p2, %p2408_p4  ;;  %449 = sbr.rel (%p2717_p3) target bundleno = 5067 (0x13cb), region = 76 }
   0xb   : > { %2411 = dma.hbm_to_vmem [thread:$0]  (!%p2409_p5), %s391_s16, 1024, %s393_s20, [#allocation3], %s2617_s26, %s2617_s26, %s2618_s27  }
   0xc   : > { %2414 = dma.hbm_to_vmem [thread:$0]  (!%p2409_p5), %s414_s23, 512, %s416_s25, [#allocation5], %s2617_s26, %s2617_s26, %s2618_s27  }
   0xe   : > { %2604 = dma.done.wait (%p2415_p2), [#allocation3], 1024  }
   0xf   : > { %2606 = vsyncadd (%p2415_p2), [#allocation3], 4294966272 }
  0x10   : > { %2608 = dma.done.wait (%p2415_p2), [#allocation5], 512  }
  0x11   : > { %2610 = vsyncadd (%p2415_p2), [#allocation5], 4294966784  ;;  %s2029_s28 = sshll.u32 %s2712_s17, 1  ;;  %v2619_v0 = vmov 0   ;;  %v2347_v2 = vld [vmem:[%s3172_s3 + $0x38] sm:$0xff]  ;;  %v2346_v3 = vld [vmem:[%s3172_s3 + $0x30] sm:$0xff]  ;;  %v524_v12 = vlaneseq }
  0x12   : > { %2440 = vset.pattern.permute.xlu0 %v2619_v0  ;;  %p505_p6 = scmp.lt.s32.totalorder %s2029_s28, 3  ;;  %605 = vmatpush.bf16.msra.mxu0 %v2347_v2  ;;  %v2345_v5 = vld [vmem:[%s3172_s3 + $0x28] sm:$0xff]  ;;  %v2344_v6 = vld [vmem:[%s3172_s3 + $0x20] sm:$0xff]  ;;  %v2343_v7 = vld [vmem:[%s3172_s3 + $0x18] sm:$0xff]  ;;  %v2620_v15 = vmov 1.0|1.0  }
  0x13   : > { %v2342_v8 = vld [vmem:[%s3172_s3 + $0x10] sm:$0xff]  ;;  %v2341_v9 = vld [vmem:[%s3172_s3 + $0x8] sm:$0xff]  ;;  %v2340_v10 = vld [vmem:[%s3172_s3] sm:$0xff]  ;;  %v2775_v13 = vand.u32 127, %v524_v12  ;;  %vm621_vm3 = vcmask 523264   ;;  %v2621_v24 = vmov 64.0  }
  0x14   : > { %s3188_s28 = smov (!%p505_p6, %s2029_s28), 3  ;;  %v555_v16 = vld [vmem:[%s3171_s2] sm:$0xff]  ;;  %v556_v20 = vld [vmem:[%s3171_s2 + $0x8] sm:$0xff]  ;;  %2467 = vrcp.f32 %v2621_v24  ;;  %v2095_v41 = vld [vmem:[%s3174_s5 + $0x30] sm:$0xf]  ;;  %p510_p7 = scmp.lt.s32.totalorder %s2712_s17, 1 }
  0x15   : > { %s3184_s30 = sshll.u32 %s3188_s28, 3  ;;  %v2355_v42 = vld [vmem:[%s3174_s5 + $0x34] sm:$0xf0]  ;;  %v2354_v43 = vld [vmem:[%s3174_s5 + $0x34] sm:$0xf]  ;;  %s2622_s25 = smov 64  }
  0x16   : > { %s2747_s18 = scalar_lea.vmem %s3169_s0, %s3184_s30  ;;  %606 = vmatpush.bf16.msra.mxu0 %v2346_v3  ;;  %v2096_v44 = vor.u32 %v2355_v42, %v2095_v41  ;;  %v2097_v45 = vld [vmem:[%s3174_s5 + $0x38] sm:$0xf0]  ;;  %v2087_v47 = vld [vmem:[%s3174_s5 + $0x20] sm:$0xf]  ;;  %v2353_v48 = vld [vmem:[%s3174_s5 + $0x24] sm:$0xf0] }
  0x17   : > { %v520_v1 = vld [vmem:[%s2747_s18] sm:$0xff]  ;;  %v521_v4 = vld [vmem:[%s2747_s18 + $0x8] sm:$0xff]  ;;  %v2100_v46 = vor.u32 %v2354_v43, %v2097_v45  ;;  %v2088_v50 = vor.u32 %v2353_v48, %v2087_v47  ;;  %v2079_v53 = vld [vmem:[%s3174_s5 + $0x10] sm:$0xf]  ;;  %s3190_s17 = smov (!%p510_p7, %s2712_s17), 1  ;;  %vm774_vm11 = vcmask 261120  }
  0x18   : > { %527 = vperm.xlu0 %2440, %v520_v1   ;;  %742 = vmatpush.bf16.msra.mxu1 %v2096_v44  ;;  %v2352_v49 = vld [vmem:[%s3174_s5 + $0x24] sm:$0xf]  ;;  %v2089_v51 = vld [vmem:[%s3174_s5 + $0x28] sm:$0xf0]  ;;  %v2351_v54 = vld [vmem:[%s3174_s5 + $0x14] sm:$0xf0]  ;;  %s512_s24 = scalar_lea.vmem %s3170_s1, %s3190_s17 }
  0x19   : > { %756 = vmatpush.bf16.msra.mxu2 %v2100_v46  ;;  %v2092_v52 = vor.u32 %v2352_v49, %v2089_v51  ;;  %v2350_v55 = vld [vmem:[%s3174_s5 + $0x14] sm:$0xf]  ;;  %v2080_v56 = vor.u32 %v2351_v54, %v2079_v53  ;;  %v2081_v57 = vld [vmem:[%s3174_s5 + $0x18] sm:$0xf0]  ;;  %v2071_v59 = vld [vmem:[%s3174_s5] sm:$0xf] }
  0x1a   : > { %607 = vmatpush.bf16.msra.mxu0 %v2345_v5  ;;  %v2468_v25 = vpop.eup %2467  ;;  %v2084_v58 = vor.u32 %v2350_v55, %v2081_v57  ;;  %v2349_v60 = vld [vmem:[%s3174_s5 + $0x4] sm:$0xf0]  ;;  %v2348_v61 = vld [vmem:[%s3174_s5 + $0x4] sm:$0xf]  ;;  %v2073_v0 = vld [vmem:[%s3174_s5 + $0x8] sm:$0xf0] }
  0x1b   : > { %v629_v26 = vmul.f32 64.0, %v2468_v25  ;;  %vm633_vm4 = vweird.f32 %v2468_v25  ;;  %v2072_v63 = vor.u32 %v2349_v60, %v2071_v59  ;;  %v2076_v2 = vor.u32 %v2348_v61, %v2073_v0  ;;  %v2881_v47 = vld [vmem:[%s512_s24] ss:$0 sm:$0xff]  ;;  %s2623_s17 = smov 32   ;;  %s2624_s26 = smov 96  }
  0x1c   : > { %743 = vmatpush.bf16.msra.mxu1 %v2088_v50  ;;  %vm795_vm12 = vcmask 130048   ;;  %s2625_s24 = smov 1  }
  0x1d   : > { %v630_v27 = vsub.f32 1.0, %v629_v26  ;;  %757 = vmatpush.bf16.msra.mxu2 %v2092_v52  ;;  %v2450_v26 = vld [vmem:[%s3173_s4 + $0x1] ss:$0 sm:$0xff] }
  0x1e   : > { %608 = vmatpush.bf16.msra.mxu0 %v2344_v6 }
  0x1f   : > { %v631_v28 = vmul.f32 %v2468_v25, %v630_v27 }
  0x20   : > { %530 = vperm.xlu0 %2440, %v521_v4   ;;  %744 = vmatpush.bf16.msra.mxu1 %v2080_v56 }
  0x21   : > { %v632_v29 = vadd.f32 %v2468_v25, %v631_v28  ;;  %758 = vmatpush.bf16.msra.mxu2 %v2084_v58 }
  0x22   : > { %609 = vmatpush.bf16.msra.mxu0 %v2343_v7 }
  0x23   : > { %v2787_v30 = vsel %vm633_vm4, %v2468_v25, %v632_v29 }
  0x24   : > { %745 = vmatpush.bf16.msra.mxu1 %v2072_v63 }
  0x25   : > { %759 = vmatpush.bf16.msra.mxu2 %v2076_v2 }
  0x26   : > { %610 = vmatpush.bf16.msra.mxu0 %v2342_v8 }
  0x2a   : > { %611 = vmatpush.bf16.msra.mxu0 %v2341_v9 }
  0x2e   : > { %612 = vmatpush.bf16.msra.mxu0 %v2340_v10 }
  0x8a   : > { %v528_v11 = vpop.permute.xlu0 %527 }
  0x8b   : > { %vm532_vm0 = vcmp.eq.s32.totalorder %v2775_v13, %v528_v11 }
  0x92   : > { %v531_v14 = vpop.permute.xlu0 %530 }
  0x93   : > { %vm533_vm1 = vcmp.eq.s32.totalorder %v2775_v13, %v531_v14 }
  0x94   : > { %vm2067_vm2 = vmpackc.low %vm533_vm1, %vm532_vm0 }
  0x95   : > { %2068 = vmatmul.msk.bf16.vlgmr.msra.gmra.mxu0 %vm2067_vm2, %v2620_v15 }
 0x112   : > { %v614_v17 = vpop.f32.mrf.mxu0 }
 0x113   : > { %v615_v18 = vadd.f32 %v614_v17, %v555_v16 }
 0x115   : > { %v622_v19 = vsel %vm621_vm3, %v615_v18, 0.0 }
 0x116   : > { %623 = vadd.xlane.f32.xlu1 %v622_v19 }
 0x11a   : > { %v616_v21 = vpop.f32.mrf.mxu0 }
 0x11b   : > { %v617_v22 = vadd.f32 %v616_v21, %v556_v20  ;;  %v2449_v21 = vld [vmem:[%s3173_s4] ss:$0 sm:$0xff] }
 0x11d   : > { %v625_v23 = vsel %vm621_vm3, %v617_v22, 0.0 }
 0x11e   : > { %626 = vadd.xlane.f32.xlu1 %v625_v23 }
 0x189   : > { %v624_v31 = vpop.xlane.xlu1 %623 }
 0x18a   : > { %v635_v32 = vmul.f32 %v2787_v30, %v624_v31 }
 0x18c   : > { %v2790_v33 = vsub.f32 %v615_v18, %v635_v32 }
 0x18e   : > { %v639_v34 = vmul.f32 %v2790_v33, %v2790_v33 }
 0x190   : > { %v641_v35 = vsel %vm621_vm3, %v639_v34, 0.0 }
 0x191   : > { %642 = vadd.xlane.f32.xlu2 %v641_v35  ;;  %v627_v36 = vpop.xlane.xlu1 %626 }
 0x192   : > { %v636_v37 = vmul.f32 %v2787_v30, %v627_v36 }
 0x194   : > { %v2796_v38 = vsub.f32 %v617_v22, %v636_v37 }
 0x196   : > { %v640_v39 = vmul.f32 %v2796_v38, %v2796_v38 }
 0x198   : > { %v644_v40 = vsel %vm621_vm3, %v640_v39, 0.0 }
 0x199   : > { %645 = vadd.xlane.f32.xlu2 %v644_v40 }
 0x204   : > { %v643_v62 = vpop.xlane.xlu2 %642 }
 0x205   : > { %v647_v1 = vmul.f32 %v643_v62, %v2787_v30 }
 0x207   : > { %v649_v3 = vadd.f32 1e-12, %v647_v1 }
 0x209   : > { %2469 = vrsqrt.f32 %v649_v3  ;;  %vm657_vm6 = vweird.f32 %v649_v3 }
 0x20c   : > { %v646_v4 = vpop.xlane.xlu2 %645 }
 0x20d   : > { %v648_v5 = vmul.f32 %v646_v4, %v2787_v30 }
 0x20f   : > { %v2470_v6 = vpop.eup %2469  ;;  %v650_v7 = vadd.f32 1e-12, %v648_v5 }
 0x210   : > { %v652_v8 = vmul.f32 %v2470_v6, %v649_v3  ;;  %vm658_vm5 = vweird.f32 %v2470_v6 }
 0x211   : > { %2471 = vrsqrt.f32 %v650_v7  ;;  %vm659_vm7 = vmor %vm657_vm6, %vm658_vm5  ;;  %vm667_vm9 = vweird.f32 %v650_v7 }
 0x212   : > { %v653_v9 = vmul.f32 %v2470_v6, %v652_v8 }
 0x214   : > { %v654_v10 = vmul.f32 0.5, %v653_v9 }
 0x216   : > { %v655_v11 = vsub.f32 1.5, %v654_v10  ;;  %v2357_v10 = vld [vmem:[%s3176_s7 + $0x8] sm:$0xff] }
 0x217   : > { %v2472_v12 = vpop.eup %2471  ;;  %964 = vmatpush.bf16.msrb.mxu0 %v2357_v10  ;;  %v2360_v10 = vld [vmem:[#allocation2] sm:$0xff] }
 0x218   : > { %v656_v14 = vmul.f32 %v2470_v6, %v655_v11  ;;  %v662_v15 = vmul.f32 %v2472_v12, %v650_v7  ;;  %vm668_vm8 = vweird.f32 %v2472_v12  ;;  %v2356_v11 = vld [vmem:[%s3176_s7] sm:$0xff] }
 0x219   : > { %vm669_vm10 = vmor %vm667_vm9, %vm668_vm8 }
 0x21a   : > { %v663_v16 = vmul.f32 %v2472_v12, %v662_v15  ;;  %v660_v17 = vsel %vm659_vm7, %v2470_v6, %v656_v14 }
 0x21b   : > { %v671_v20 = vmul.f32 %v660_v17, %v2790_v33  ;;  %v689_v33 = vld [vmem:[%s3175_s6] sm:$0x3]  ;;  %965 = vmatpush.bf16.msrb.mxu0 %v2356_v11 }
 0x21c   : > { %v664_v18 = vmul.f32 0.5, %v663_v16  ;;  %v691_v34 = vperm.slane %v689_v33, 0  ;;  %v692_v41 = vperm.slane %v689_v33, 1 }
 0x21d   : > { %v674_v25 = vmul.f32 %v2449_v21, %v671_v20 }
 0x21e   : > { %v665_v19 = vsub.f32 1.5, %v664_v18 }
 0x21f   : > { %v2859_v28 = vadd.f32 %v2450_v26, %v674_v25 }
 0x220   : > { %v666_v22 = vmul.f32 %v2472_v12, %v665_v19 }
 0x222   : > { %v670_v23 = vsel %vm669_vm10, %v2472_v12, %v666_v22 }
 0x223   : > { %v672_v24 = vmul.f32 %v670_v23, %v2796_v38 }
 0x225   : > { %v675_v27 = vmul.f32 %v2449_v21, %v672_v24 }
 0x227   : > { %v2861_v29 = vadd.f32 %v2450_v26, %v675_v27 }
 0x229   : > { %v680_v31 = vpack.c.bf16 %v2861_v29, %v2859_v28 }
 0x22b   : > { %2101 = vmatmul.msk.bf16.vlgmr.msra.gmra.mxu1 %vm621_vm3, %v680_v31  ;;  %2102 = vmatmul.msk.bf16.vlgmr.msra.gmra.mxu2 %vm621_vm3, %v680_v31 }
 0x2a8   : > { %v747_v32 = vpop.f32.mrf.mxu1 }
 0x2a9   : > { %v748_v36 = vadd.f32 %v747_v32, %v691_v34 }
 0x2ae   : > { %v761_v39 = vpop.f32.mrf.mxu2 }
 0x2af   : > { %v762_v43 = vadd.f32 %v761_v39, %v692_v41 }
 0x2b0   : > { %v749_v35 = vpop.f32.mrf.mxu1 }
 0x2b1   : > { %v750_v37 = vadd.f32 %v749_v35, %v691_v34 }
 0x2b3   : > { %v766_v38 = vpack.c.bf16 %v750_v37, %v748_v36 }
 0x2b5   : > { %772 = vrot.lane.b32.xlu0 %v766_v38, %s2622_s25 }
 0x2b6   : > { %v763_v40 = vpop.f32.mrf.mxu2 }
 0x2b7   : > { %v764_v42 = vadd.f32 %v763_v40, %v692_v41 }
 0x2b9   : > { %v2877_v46 = vpack.c.bf16 %v764_v42, %v762_v43  ;;  %v2359_v43 = vld [vmem:[%s3176_s7 + $0x18] sm:$0xff] }
 0x327   : > { %v773_v44 = vpop.permute.xlu0 %772 }
 0x328   : > { %v779_v45 = vsel %vm774_vm11, %v773_v44, 0  ;;  %v2358_v44 = vld [vmem:[%s3176_s7 + $0x10] sm:$0xff] }
 0x329   : > { %788 = vmatpush.bf16.xpose.msra.mxu3 %v779_v45 }
 0x330   : > { %2103 = vmatmul.msk.bf16.vlgmr.msra.gmra.mxu3 %vm774_vm11, %v766_v38 }
 0x331   : > { %829 = vmatpush.bf16.msrb.mxu3 %v2877_v46 }
 0x3b3   : > { %v790_v48 = vpop.f32.mrf.mxu3 }
 0x3b4   : > { %v791_v49 = vadd.f32 %v2881_v47, %v790_v48 }
 0x3b6   : > { %v796_v50 = vsel %vm795_vm12, %v791_v49, -inf }
 0x3b7   : > { %797 = vmax.xlane.f32.xlu1 %v796_v50  ;;  %v2452_v50 = vld [vmem:[%s3179_s10] ss:$0 sm:$0xff] }
 0x3bb   : > { %v792_v51 = vpop.f32.mrf.mxu3 }
 0x3bc   : > { %v793_v52 = vadd.f32 %v2881_v47, %v792_v51 }
 0x3be   : > { %v799_v53 = vsel %vm795_vm12, %v793_v52, -inf }
 0x3bf   : > { %800 = vmax.xlane.f32.xlu2 %v799_v53 }
 0x3d7   : > { %843 = vrot.lane.b32.xlu2 %v766_v38, %s2623_s17 }
 0x42a   : > { %v798_v54 = vpop.xlane.xlu1 %797 }
 0x42b   : > { %v802_v55 = vsub.f32 %v791_v49, %v798_v54 }
 0x42d   : > { %v804_v56 = vmul.f32 1.442695, %v802_v55 }
 0x42f   : > { %2473 = vpow2.f32 %v804_v56 }
 0x432   : > { %v801_v57 = vpop.xlane.xlu2 %800 }
 0x433   : > { %v803_v58 = vsub.f32 %v793_v52, %v801_v57 }
 0x435   : > { %v2474_v59 = vpop.eup %2473  ;;  %v806_v60 = vmul.f32 1.442695, %v803_v58 }
 0x436   : > { %v808_v61 = vsel %vm795_vm12, %v2474_v59, 0.0 }
 0x437   : > { %2475 = vpow2.f32 %v806_v60  ;;  %809 = vadd.xlane.f32.xlu0 %v808_v61 }
 0x43a   : > { %v844_v62 = vpop.permute.xlu2 %843 }
 0x43b   : > { %v849_v63 = vsel %vm774_vm11, %v844_v62, 0 }
 0x43c   : > { %858 = vmatpush.bf16.xpose.msra.mxu3 %v849_v63 }
 0x43d   : > { %v2476_v0 = vpop.eup %2475 }
 0x43e   : > { %v811_v1 = vsel %vm795_vm12, %v2476_v0, 0.0 }
 0x43f   : > { %812 = vadd.xlane.f32.xlu1 %v811_v1 }
 0x458   : > { %841 = vrot.lane.b32.xlu1 %v766_v38, %s2624_s26 }
 0x4aa   : > { %v810_v2 = vpop.xlane.xlu0 %809 }
 0x4ab   : > { %2477 = vrcp.f32 %v810_v2 }
 0x4b1   : > { %v2478_v4 = vpop.eup %2477 }
 0x4b2   : > { %v813_v3 = vpop.xlane.xlu1 %812  ;;  %v816_v6 = vmul.f32 %v2478_v4, %v2474_v59 }
 0x4b3   : > { %2479 = vrcp.f32 %v813_v3 }
 0x4b9   : > { %v2480_v5 = vpop.eup %2479 }
 0x4ba   : > { %v817_v7 = vmul.f32 %v2480_v5, %v2476_v0 }
 0x4bc   : > { %v818_v8 = vpack.c.bf16 %v817_v7, %v816_v6  ;;  %v2362_v7 = vld [vmem:[#allocation2 + $0x10] sm:$0xff] }
 0x4be   : > { %2104 = vmatmul.msk.bf16.vlgmr.msrb.gmra.mxu3 %vm795_vm12, %v818_v8  ;;  %v2361_v8 = vld [vmem:[#allocation2 + $0x8] sm:$0xff] }
 0x4bf   : > { %935 = vmatpush.bf16.msrb.mxu3 %v2359_v43  ;;  %v2371_v43 = vld [vmem:[%s3178_s9 + $0x38] sm:$0xff] }
 0x4c3   : > { %936 = vmatpush.bf16.msrb.mxu3 %v2358_v44  ;;  %v2370_v44 = vld [vmem:[%s3178_s9 + $0x30] sm:$0xff] }
 0x4ca   : > { %v842_v9 = vpop.permute.xlu1 %841 }
 0x4ce   : > { %2105 = vmatmul.msk.bf16.vlgmr.msra.gmra.mxu3 %vm774_vm11, %v842_v9 }
 0x541   : > { %v831_v12 = vpop.f32.mrf.mxu3 }
 0x549   : > { %v833_v14 = vpop.f32.mrf.mxu3 }
 0x54a   : > { %v836_v15 = vpack.c.bf16 %v833_v14, %v831_v12 }
 0x54c   : > { %2124 = vmatmul.msk.bf16.vlgmr.msrb.gmra.mxu0 %vm774_vm11, %v836_v15 }
 0x551   : > { %v860_v16 = vpop.f32.mrf.mxu3 }
 0x552   : > { %v861_v17 = vadd.f32 %v2881_v47, %v860_v16 }
 0x554   : > { %v865_v18 = vsel %vm795_vm12, %v861_v17, -inf }
 0x555   : > { %866 = vmax.xlane.f32.xlu2 %v865_v18 }
 0x559   : > { %v862_v19 = vpop.f32.mrf.mxu3 }
 0x55a   : > { %v863_v20 = vadd.f32 %v2881_v47, %v862_v19 }
 0x55c   : > { %v868_v21 = vsel %vm795_vm12, %v863_v20, -inf }
 0x55d   : > { %869 = vmax.xlane.f32.xlu1 %v868_v21 }
 0x5c8   : > { %v867_v22 = vpop.xlane.xlu2 %866 }
 0x5c9   : > { %v871_v23 = vsub.f32 %v861_v17, %v867_v22  ;;  %v967_v49 = vpop.f32.mrf.mxu0 }
 0x5cb   : > { %v873_v24 = vmul.f32 1.442695, %v871_v23 }
 0x5cd   : > { %2481 = vpow2.f32 %v873_v24 }
 0x5d0   : > { %v870_v25 = vpop.xlane.xlu1 %869 }
 0x5d1   : > { %v872_v26 = vsub.f32 %v863_v20, %v870_v25  ;;  %v969_v56 = vpop.f32.mrf.mxu0 }
 0x5d3   : > { %v2482_v27 = vpop.eup %2481  ;;  %v875_v31 = vmul.f32 1.442695, %v872_v26 }
 0x5d4   : > { %v877_v32 = vsel %vm795_vm12, %v2482_v27, 0.0 }
 0x5d5   : > { %2483 = vpow2.f32 %v875_v31  ;;  %878 = vadd.xlane.f32.xlu0 %v877_v32 }
 0x5db   : > { %v2484_v33 = vpop.eup %2483 }
 0x5dc   : > { %v880_v34 = vsel %vm795_vm12, %v2484_v33, 0.0 }
 0x5dd   : > { %881 = vadd.xlane.f32.xlu0 %v880_v34 }
 0x5f1   : > { %889 = vrot.lane.b32.xlu0 %v2877_v46, %s2624_s26 }
 0x648   : > { %v879_v35 = vpop.xlane.xlu0 %878 }
 0x650   : > { %v882_v36 = vpop.xlane.xlu0 %881 }
 0x651   : > { %2485 = vrcp.f32 %v882_v36 }
 0x652   : > { %2487 = vrcp.f32 %v879_v35 }
 0x657   : > { %v2486_v37 = vpop.eup %2485 }
 0x658   : > { %v2488_v38 = vpop.eup %2487  ;;  %v886_v39 = vmul.f32 %v2486_v37, %v2484_v33  ;;  %v2453_v33 = vld [vmem:[%s3179_s10 + $0x1] ss:$0 sm:$0xff] }
 0x659   : > { %v885_v40 = vmul.f32 %v2488_v38, %v2482_v27  ;;  %v2454_v38 = vld [vmem:[%s3179_s10 + $0x2] ss:$0 sm:$0xff] }
 0x65b   : > { %v887_v42 = vpack.c.bf16 %v886_v39, %v885_v40 }
 0x663   : > { %v890_v41 = vpop.permute.xlu0 %889 }
 0x664   : > { %902 = vmatpush.bf16.msrb.mxu2 %v890_v41 }
 0x667   : > { %2106 = vmatmul.msk.bf16.vlgmr.msrb.gmra.mxu2 %vm795_vm12, %v887_v42 }
 0x668   : > { %1169 = vmatpush.bf16.msra.mxu2 %v2371_v43  ;;  %v2203_v43 = vld [vmem:[%s3174_s5 + $0x68] sm:$0xf0] }
 0x66c   : > { %1170 = vmatpush.bf16.msra.mxu2 %v2370_v44 }
 0x6ea   : > { %v904_v45 = vpop.f32.mrf.mxu2 }
 0x6f2   : > { %v906_v46 = vpop.f32.mrf.mxu2 }
 0x6f3   : > { %v909_v48 = vpack.c.bf16 %v906_v46, %v904_v45  ;;  %v2369_v45 = vld [vmem:[%s3178_s9 + $0x28] sm:$0xff]  ;;  %v2368_v46 = vld [vmem:[%s3178_s9 + $0x20] sm:$0xff] }
 0x6f4   : > { %1171 = vmatpush.bf16.msra.mxu2 %v2369_v45  ;;  %v2193_v45 = vld [vmem:[%s3174_s5 + $0x50] sm:$0xf] }
 0x6f5   : > { %2115 = vmatmul.msk.bf16.vlgmr.msrb.gmra.mxu3 %vm774_vm11, %v909_v48  ;;  %v2367_v48 = vld [vmem:[%s3178_s9 + $0x18] sm:$0xff] }
 0x6f8   : > { %1172 = vmatpush.bf16.msra.mxu2 %v2368_v46  ;;  %v2375_v46 = vld [vmem:[%s3174_s5 + $0x54] sm:$0xf0] }
 0x6fc   : > { %1173 = vmatpush.bf16.msra.mxu2 %v2367_v48  ;;  %v2374_v48 = vld [vmem:[%s3174_s5 + $0x54] sm:$0xf] }
 0x778   : > { %v938_v51 = vpop.f32.mrf.mxu3 }
 0x779   : > { %v968_v52 = vadd.f32 %v967_v49, %v938_v51  ;;  %v2366_v49 = vld [vmem:[%s3178_s9 + $0x10] sm:$0xff]  ;;  %v2364_v51 = vld [vmem:[%s3178_s9] sm:$0xff] }
 0x77a   : > { %1174 = vmatpush.bf16.msra.mxu2 %v2366_v49  ;;  %v2194_v49 = vor.u32 %v2375_v46, %v2193_v45 }
 0x77b   : > { %v974_v53 = vadd.f32 %v2452_v50, %v968_v52  ;;  %v2455_v52 = vld [vmem:[%s3180_s11] ss:$0 sm:$0xff] }
 0x77d   : > { %v976_v54 = vadd.f32 %v974_v53, %v2859_v28 }
 0x77f   : > { %v980_v55 = vsel %vm621_vm3, %v976_v54, 0.0 }
 0x780   : > { %981 = vadd.xlane.f32.xlu2 %v980_v55  ;;  %v940_v57 = vpop.f32.mrf.mxu3 }
 0x781   : > { %v970_v58 = vadd.f32 %v969_v56, %v940_v57 }
 0x783   : > { %v975_v59 = vadd.f32 %v2452_v50, %v970_v58  ;;  %v2365_v50 = vld [vmem:[%s3178_s9 + $0x8] sm:$0xff] }
 0x784   : > { %1175 = vmatpush.bf16.msra.mxu2 %v2365_v50  ;;  %v2195_v50 = vld [vmem:[%s3174_s5 + $0x58] sm:$0xf0] }
 0x785   : > { %v977_v60 = vadd.f32 %v975_v59, %v2861_v29  ;;  %v2363_v29 = vld [vmem:[#allocation2 + $0x18] sm:$0xff] }
 0x786   : > { %1074 = vmatpush.bf16.msrb.mxu1 %v2363_v29 }
 0x787   : > { %v983_v61 = vsel %vm621_vm3, %v977_v60, 0.0 }
 0x788   : > { %984 = vadd.xlane.f32.xlu2 %v983_v61  ;;  %1176 = vmatpush.bf16.msra.mxu2 %v2364_v51  ;;  %v2198_v51 = vor.u32 %v2374_v48, %v2195_v50 }
 0x78a   : > { %1075 = vmatpush.bf16.msrb.mxu1 %v2362_v7 }
 0x78e   : > { %1076 = vmatpush.bf16.msrb.mxu1 %v2361_v8 }
 0x792   : > { %1077 = vmatpush.bf16.msrb.mxu1 %v2360_v10  ;;  %v2456_v10 = vld [vmem:[%s3179_s10 + $0x3] ss:$0 sm:$0xff] }
 0x7f3   : > { %v982_v62 = vpop.xlane.xlu2 %981 }
 0x7f4   : > { %v986_v63 = vmul.f32 %v982_v62, %v2787_v30 }
 0x7f6   : > { %v988_v0 = vsub.f32 %v976_v54, %v986_v63 }
 0x7f8   : > { %v990_v1 = vmul.f32 %v988_v0, %v988_v0 }
 0x7fa   : > { %v992_v2 = vsel %vm621_vm3, %v990_v1, 0.0 }
 0x7fb   : > { %993 = vadd.xlane.f32.xlu1 %v992_v2  ;;  %v985_v28 = vpop.xlane.xlu2 %984 }
 0x7fc   : > { %v987_v3 = vmul.f32 %v985_v28, %v2787_v30 }
 0x7fe   : > { %v989_v4 = vsub.f32 %v977_v60, %v987_v3 }
 0x800   : > { %v991_v5 = vmul.f32 %v989_v4, %v989_v4 }
 0x802   : > { %v995_v6 = vsel %vm621_vm3, %v991_v5, 0.0 }
 0x803   : > { %996 = vadd.xlane.f32.xlu0 %v995_v6 }
 0x86e   : > { %v994_v9 = vpop.xlane.xlu1 %993 }
 0x86f   : > { %v998_v11 = vmul.f32 %v994_v9, %v2787_v30 }
 0x871   : > { %v1000_v12 = vadd.f32 1e-12, %v998_v11 }
 0x873   : > { %2489 = vrsqrt.f32 %v1000_v12  ;;  %vm1008_vm14 = vweird.f32 %v1000_v12 }
 0x876   : > { %v997_v14 = vpop.xlane.xlu0 %996 }
 0x877   : > { %v999_v15 = vmul.f32 %v997_v14, %v2787_v30 }
 0x879   : > { %v2490_v16 = vpop.eup %2489  ;;  %v1001_v17 = vadd.f32 1e-12, %v999_v15 }
 0x87a   : > { %v1003_v18 = vmul.f32 %v2490_v16, %v1000_v12  ;;  %vm1009_vm13 = vweird.f32 %v2490_v16 }
 0x87b   : > { %2491 = vrsqrt.f32 %v1001_v17  ;;  %vm1010_vm15 = vmor %vm1008_vm14, %vm1009_vm13  ;;  %vm1018_vm1 = vweird.f32 %v1001_v17 }
 0x87c   : > { %v1004_v19 = vmul.f32 %v2490_v16, %v1003_v18 }
 0x87e   : > { %v1005_v20 = vmul.f32 0.5, %v1004_v19 }
 0x880   : > { %v1006_v21 = vsub.f32 1.5, %v1005_v20 }
 0x881   : > { %v2492_v22 = vpop.eup %2491 }
 0x882   : > { %v1007_v23 = vmul.f32 %v2490_v16, %v1006_v21  ;;  %v1013_v24 = vmul.f32 %v2492_v22, %v1001_v17  ;;  %vm1019_vm0 = vweird.f32 %v2492_v22 }
 0x883   : > { %vm1020_vm2 = vmor %vm1018_vm1, %vm1019_vm0 }
 0x884   : > { %v1014_v25 = vmul.f32 %v2492_v22, %v1013_v24  ;;  %v1011_v26 = vsel %vm1010_vm15, %v2490_v16, %v1007_v23 }
 0x885   : > { %v1022_v32 = vmul.f32 %v1011_v26, %v988_v0 }
 0x886   : > { %v1015_v27 = vmul.f32 0.5, %v1014_v25 }
 0x887   : > { %v1025_v37 = vmul.f32 %v2453_v33, %v1022_v32 }
 0x888   : > { %v1016_v31 = vsub.f32 1.5, %v1015_v27 }
 0x889   : > { %v1028_v40 = vadd.f32 %v2454_v38, %v1025_v37  ;;  %v2211_v37 = vld [vmem:[%s3174_s5 + $0x78] sm:$0xf0] }
 0x88a   : > { %v1017_v34 = vmul.f32 %v2492_v22, %v1016_v31 }
 0x88c   : > { %v1021_v35 = vsel %vm1020_vm2, %v2492_v22, %v1017_v34  ;;  %v2379_v34 = vld [vmem:[%s3174_s5 + $0x74] sm:$0xf0] }
 0x88d   : > { %v1023_v36 = vmul.f32 %v1021_v35, %v989_v4  ;;  %v2378_v35 = vld [vmem:[%s3174_s5 + $0x74] sm:$0xf] }
 0x88f   : > { %v1026_v39 = vmul.f32 %v2453_v33, %v1023_v36  ;;  %v2209_v33 = vld [vmem:[%s3174_s5 + $0x70] sm:$0xf] }
 0x890   : > { %v2210_v36 = vor.u32 %v2379_v34, %v2209_v33 }
 0x891   : > { %v1029_v41 = vadd.f32 %v2454_v38, %v1026_v39  ;;  %v2214_v38 = vor.u32 %v2378_v35, %v2211_v37  ;;  %v2201_v39 = vld [vmem:[%s3174_s5 + $0x60] sm:$0xf] }
 0x892   : > { %1301 = vmatpush.bf16.msra.mxu3 %v2210_v36 }
 0x893   : > { %v1030_v42 = vpack.c.bf16 %v1029_v41, %v1028_v40  ;;  %1315 = vmatpush.bf16.msra.mxu0 %v2214_v38 }
 0x895   : > { %2141 = vmatmul.msk.bf16.vlgmr.msrb.gmra.mxu1 %vm621_vm3, %v1030_v42 }
 0x912   : > { %v1079_v53 = vpop.f32.mrf.mxu1 }
 0x913   : > { %v1080_v54 = vadd.f32 %v2455_v52, %v1079_v53 }
 0x915   : > { %v1086_v55 = vmul.f32 0.044715, %v1080_v54  ;;  %v1084_v5 = vmul.f32 0.5, %v1080_v54 }
 0x917   : > { %v1088_v56 = vmul.f32 %v1086_v55, %v1080_v54  ;;  %v2373_v55 = vld [vmem:[%s3174_s5 + $0x44] sm:$0xf0] }
 0x919   : > { %v1090_v57 = vmul.f32 %v1088_v56, %v1080_v54  ;;  %v2372_v56 = vld [vmem:[%s3174_s5 + $0x44] sm:$0xf] }
 0x91a   : > { %v1081_v58 = vpop.f32.mrf.mxu1 }
 0x91b   : > { %v1092_v59 = vadd.f32 %v1090_v57, %v1080_v54  ;;  %v1082_v60 = vadd.f32 %v2455_v52, %v1081_v58  ;;  %v2185_v54 = vld [vmem:[%s3174_s5 + $0x40] sm:$0xf]  ;;  %v2187_v58 = vld [vmem:[%s3174_s5 + $0x48] sm:$0xf0] }
 0x91c   : > { %v2186_v57 = vor.u32 %v2373_v55, %v2185_v54 }
 0x91d   : > { %v1087_v61 = vmul.f32 0.044715, %v1082_v60  ;;  %v1094_v62 = vmul.f32 0.7978846, %v1092_v59  ;;  %v1085_v6 = vmul.f32 0.5, %v1082_v60 }
 0x91f   : > { %v1089_v63 = vmul.f32 %v1087_v61, %v1082_v60  ;;  %2493 = vtanh.f32 %v1094_v62 }
 0x921   : > { %v1091_v0 = vmul.f32 %v1089_v63, %v1082_v60 }
 0x923   : > { %v1093_v1 = vadd.f32 %v1091_v0, %v1082_v60  ;;  %v2190_v60 = vor.u32 %v2372_v56, %v2187_v58 }
 0x925   : > { %v1095_v2 = vmul.f32 0.7978846, %v1093_v1  ;;  %v2494_v28 = vpop.eup %2493 }
 0x926   : > { %v1098_v3 = vadd.f32 1.0, %v2494_v28 }
 0x927   : > { %2495 = vtanh.f32 %v1095_v2 }
 0x928   : > { %v1100_v7 = vmul.f32 %v1098_v3, %v1084_v5 }
 0x92d   : > { %v2496_v4 = vpop.eup %2495 }
 0x92e   : > { %v1099_v29 = vadd.f32 1.0, %v2496_v4 }
 0x930   : > { %v1101_v8 = vmul.f32 %v1099_v29, %v1085_v6 }
 0x932   : > { %v1102_v9 = vpack.c.bf16 %v1101_v8, %v1100_v7 }
 0x934   : > { %1177 = vmatmul.bf16.vlgmr.msra.gmra.mxu2 %v1102_v9 }
 0x9b7   : > { %v1178_v11 = vpop.f32.mrf.mxu2 }
 0x9b8   : > { %v1179_v12 = vadd.f32 %v2456_v10, %v1178_v11 }
 0x9ba   : > { %v1183_v14 = vadd.f32 %v1179_v12, %v1028_v40  ;;  %v2377_v40 = vld [vmem:[%s3174_s5 + $0x64] sm:$0xf0] }
 0x9bb   : > { %v2202_v42 = vor.u32 %v2377_v40, %v2201_v39 }
 0x9bc   : > { %v1187_v15 = vsel %vm621_vm3, %v1183_v14, 0.0 }
 0x9bd   : > { %1188 = vadd.xlane.f32.xlu2 %v1187_v15  ;;  %1302 = vmatpush.bf16.msra.mxu3 %v2202_v42  ;;  %v2458_v15 = vld [vmem:[%s3179_s10 + $0x5] ss:$0 sm:$0xff] }
 0x9bf   : > { %v1180_v16 = vpop.f32.mrf.mxu2 }
 0x9c0   : > { %v1181_v17 = vadd.f32 %v2456_v10, %v1180_v16  ;;  %v2457_v10 = vld [vmem:[%s3179_s10 + $0x4] ss:$0 sm:$0xff] }
 0x9c1   : > { %1303 = vmatpush.bf16.msra.mxu3 %v2194_v49 }
 0x9c2   : > { %v1184_v18 = vadd.f32 %v1181_v17, %v1029_v41  ;;  %v2376_v41 = vld [vmem:[%s3174_s5 + $0x64] sm:$0xf] }
 0x9c3   : > { %v2206_v44 = vor.u32 %v2376_v41, %v2203_v43 }
 0x9c4   : > { %v1190_v19 = vsel %vm621_vm3, %v1184_v18, 0.0 }
 0x9c5   : > { %1191 = vadd.xlane.f32.xlu1 %v1190_v19  ;;  %1316 = vmatpush.bf16.msra.mxu0 %v2206_v44 }
 0x9c6   : > { %1304 = vmatpush.bf16.msra.mxu3 %v2186_v57 }
 0x9c9   : > { %1317 = vmatpush.bf16.msra.mxu0 %v2198_v51 }
 0x9cd   : > { %1318 = vmatpush.bf16.msra.mxu0 %v2190_v60 }
 0xa30   : > { %v1189_v20 = vpop.xlane.xlu2 %1188 }
 0xa31   : > { %v1193_v21 = vmul.f32 %v1189_v20, %v2787_v30 }
 0xa33   : > { %v2970_v22 = vsub.f32 %v1183_v14, %v1193_v21 }
 0xa35   : > { %v1197_v23 = vmul.f32 %v2970_v22, %v2970_v22 }
 0xa37   : > { %v1199_v24 = vsel %vm621_vm3, %v1197_v23, 0.0  ;;  %v2182_v23 = vld [vmem:[%s3175_s6 + $0x2] sm:$0x3] }
 0xa38   : > { %v1192_v25 = vpop.xlane.xlu1 %1191  ;;  %1200 = vadd.xlane.f32.xlu2 %v1199_v24  ;;  %v1251_v24 = vperm.slane %v2182_v23, 1 }
 0xa39   : > { %v1194_v26 = vmul.f32 %v1192_v25, %v2787_v30 }
 0xa3b   : > { %v2976_v27 = vsub.f32 %v1184_v18, %v1194_v26 }
 0xa3d   : > { %v1198_v31 = vmul.f32 %v2976_v27, %v2976_v27 }
 0xa3f   : > { %v1202_v32 = vsel %vm621_vm3, %v1198_v31, 0.0 }
 0xa40   : > { %1203 = vadd.xlane.f32.xlu1 %v1202_v32  ;;  %v1250_v32 = vperm.slane %v2182_v23, 0 }
 0xaab   : > { %v1201_v52 = vpop.xlane.xlu2 %1200 }
 0xaac   : > { %v1205_v53 = vmul.f32 %v1201_v52, %v2787_v30 }
 0xaae   : > { %v1207_v59 = vadd.f32 1e-12, %v1205_v53 }
 0xab0   : > { %2497 = vrsqrt.f32 %v1207_v59  ;;  %vm1215_vm5 = vweird.f32 %v1207_v59 }
 0xab3   : > { %v1204_v61 = vpop.xlane.xlu1 %1203 }
 0xab4   : > { %v1206_v62 = vmul.f32 %v1204_v61, %v2787_v30 }
 0xab6   : > { %v2498_v63 = vpop.eup %2497  ;;  %v1208_v0 = vadd.f32 1e-12, %v1206_v62 }
 0xab7   : > { %v1210_v1 = vmul.f32 %v2498_v63, %v1207_v59  ;;  %vm1216_vm4 = vweird.f32 %v2498_v63 }
 0xab8   : > { %2499 = vrsqrt.f32 %v1208_v0  ;;  %vm1217_vm6 = vmor %vm1215_vm5, %vm1216_vm4  ;;  %vm1225_vm8 = vweird.f32 %v1208_v0 }
 0xab9   : > { %v1211_v2 = vmul.f32 %v2498_v63, %v1210_v1 }
 0xabb   : > { %v1212_v28 = vmul.f32 0.5, %v1211_v2 }
 0xabd   : > { %v1213_v3 = vsub.f32 1.5, %v1212_v28 }
 0xabe   : > { %v2500_v4 = vpop.eup %2499 }
 0xabf   : > { %v1214_v5 = vmul.f32 %v2498_v63, %v1213_v3  ;;  %v1220_v6 = vmul.f32 %v2500_v4, %v1208_v0  ;;  %vm1226_vm7 = vweird.f32 %v2500_v4 }
 0xac0   : > { %vm1227_vm9 = vmor %vm1225_vm8, %vm1226_vm7 }
 0xac1   : > { %v1221_v29 = vmul.f32 %v2500_v4, %v1220_v6  ;;  %v1218_v7 = vsel %vm1217_vm6, %v2498_v63, %v1214_v5 }
 0xac2   : > { %v1229_v11 = vmul.f32 %v1218_v7, %v2970_v22 }
 0xac3   : > { %v1222_v8 = vmul.f32 0.5, %v1221_v29 }
 0xac4   : > { %v1232_v16 = vmul.f32 %v2457_v10, %v1229_v11 }
 0xac5   : > { %v1223_v9 = vsub.f32 1.5, %v1222_v8 }
 0xac6   : > { %v3039_v19 = vadd.f32 %v2458_v15, %v1232_v16 }
 0xac7   : > { %v1224_v12 = vmul.f32 %v2500_v4, %v1223_v9 }
 0xac9   : > { %v1228_v14 = vsel %vm1227_vm9, %v2500_v4, %v1224_v12 }
 0xaca   : > { %v1230_v17 = vmul.f32 %v1228_v14, %v2976_v27 }
 0xacc   : > { %v1233_v18 = vmul.f32 %v2457_v10, %v1230_v17 }
 0xace   : > { %v3041_v20 = vadd.f32 %v2458_v15, %v1233_v18 }
 0xad0   : > { %v1237_v21 = vpack.c.bf16 %v3041_v20, %v3039_v19 }
 0xad2   : > { %2215 = vmatmul.msk.bf16.vlgmr.msra.gmra.mxu3 %vm621_vm3, %v1237_v21  ;;  %2216 = vmatmul.msk.bf16.vlgmr.msra.gmra.mxu0 %vm621_vm3, %v1237_v21 }
 0xb4f   : > { %v1320_v22 = vpop.f32.mrf.mxu0 }
 0xb50   : > { %v1321_v27 = vadd.f32 %v1320_v22, %v1251_v24 }
 0xb55   : > { %v1306_v25 = vpop.f32.mrf.mxu3 }
 0xb56   : > { %v1307_v35 = vadd.f32 %v1306_v25, %v1250_v32 }
 0xb57   : > { %v1322_v26 = vpop.f32.mrf.mxu0 }
 0xb58   : > { %v1323_v31 = vadd.f32 %v1322_v26, %v1251_v24 }
 0xb5a   : > { %v1326_v33 = vpack.c.bf16 %v1323_v31, %v1321_v27  ;;  %v2381_v27 = vld [vmem:[%s3176_s7 + $0x28] sm:$0xff]  ;;  %v2380_v31 = vld [vmem:[%s3176_s7 + $0x20] sm:$0xff] }
 0xb5c   : > { %1383 = vmatpush.bf16.msrb.mxu3 %v1326_v33 }
 0xb5d   : > { %v1308_v34 = vpop.f32.mrf.mxu3 }
 0xb5e   : > { %v1309_v36 = vadd.f32 %v1308_v34, %v1250_v32  ;;  %v2383_v32 = vld [vmem:[%s3176_s7 + $0x38] sm:$0xff] }
 0xb5f   : > { %1490 = vmatpush.bf16.msrb.mxu2 %v2383_v32 }
 0xb60   : > { %v1325_v37 = vpack.c.bf16 %v1309_v36, %v1307_v35  ;;  %1519 = vmatpush.bf16.msra.mxu3 %v2381_v27 }
 0xb62   : > { %1396 = vrot.lane.b32.xlu0 %v1325_v37, %s2624_s26  ;;  %1398 = vrot.lane.b32.xlu1 %v1325_v37, %s2623_s17  ;;  %s3186_s17 = sshll.u32 %s3188_s28, 3 }
 0xb63   : > { %1328 = vrot.lane.b32.xlu2 %v1325_v37, %s2622_s25  ;;  %s517_s20 = scalar_lea.vmem %s3183_s14, %s3186_s17 }
 0xb64   : > { %1520 = vmatpush.bf16.msra.mxu3 %v2380_v31 }
 0xbbd   : > { %v1329_v38 = vpop.permute.xlu2 %1328 }
 0xbbe   : > { %v1334_v39 = vsel %vm774_vm11, %v1329_v38, 0 }
 0xbbf   : > { %1343 = vmatpush.bf16.xpose.msra.mxu1 %v1334_v39 }
 0xbc6   : > { %2217 = vmatmul.msk.bf16.vlgmr.msra.gmra.mxu1 %vm774_vm11, %v1325_v37 }
 0xbd4   : > { %v1399_v40 = vpop.permute.xlu1 %1398  ;;  %v1397_v42 = vpop.permute.xlu0 %1396 }
 0xbd5   : > { %v1404_v41 = vsel %vm774_vm11, %v1399_v40, 0 }
 0xbd6   : > { %1413 = vmatpush.bf16.xpose.msrb.mxu0 %v1404_v41  ;;  %v2459_v41 = vld [vmem:[%s3179_s10 + $0x8] ss:$0 sm:$0xff] }
 0xbdd   : > { %2223 = vmatmul.msk.bf16.vlgmr.msrb.gmra.mxu0 %vm774_vm11, %v1397_v42 }
 0xc43   : > { %v1345_v43 = vpop.f32.mrf.mxu1 }
 0xc44   : > { %v1346_v44 = vadd.f32 %v2881_v47, %v1345_v43 }
 0xc46   : > { %v1350_v45 = vsel %vm795_vm12, %v1346_v44, -inf }
 0xc47   : > { %1351 = vmax.xlane.f32.xlu2 %v1350_v45 }
 0xc4b   : > { %v1347_v46 = vpop.f32.mrf.mxu1 }
 0xc4c   : > { %v1348_v48 = vadd.f32 %v2881_v47, %v1347_v46 }
 0xc4e   : > { %v1353_v49 = vsel %vm795_vm12, %v1348_v48, -inf }
 0xc4f   : > { %1354 = vmax.xlane.f32.xlu1 %v1353_v49 }
 0xc5a   : > { %v1415_v50 = vpop.f32.mrf.mxu0 }
 0xc5b   : > { %v1416_v51 = vadd.f32 %v2881_v47, %v1415_v50 }
 0xc5d   : > { %v1420_v52 = vsel %vm795_vm12, %v1416_v51, -inf }
 0xc5e   : > { %1421 = vmax.xlane.f32.xlu0 %v1420_v52 }
 0xc62   : > { %v1417_v53 = vpop.f32.mrf.mxu0 }
 0xc63   : > { %v1418_v54 = vadd.f32 %v2881_v47, %v1417_v53 }
 0xc65   : > { %v1423_v55 = vsel %vm795_vm12, %v1418_v54, -inf }
 0xc66   : > { %1424 = vmax.xlane.f32.xlu2 %v1423_v55 }
 0xc72   : > { %1444 = vrot.lane.b32.xlu0 %v1326_v33, %s2624_s26  ;;  %v2382_v33 = vld [vmem:[%s3176_s7 + $0x30] sm:$0xff] }
 0xc73   : > { %1491 = vmatpush.bf16.msrb.mxu2 %v2382_v33 }
 0xcba   : > { %v1352_v56 = vpop.xlane.xlu2 %1351 }
 0xcbb   : > { %v1356_v57 = vsub.f32 %v1346_v44, %v1352_v56 }
 0xcbd   : > { %v1358_v58 = vmul.f32 1.442695, %v1356_v57 }
 0xcbf   : > { %2501 = vpow2.f32 %v1358_v58 }
 0xcc2   : > { %v1355_v59 = vpop.xlane.xlu1 %1354 }
 0xcc3   : > { %v1357_v60 = vsub.f32 %v1348_v48, %v1355_v59 }
 0xcc5   : > { %v2502_v61 = vpop.eup %2501  ;;  %v1360_v62 = vmul.f32 1.442695, %v1357_v60 }
 0xcc6   : > { %v1362_v63 = vsel %vm795_vm12, %v2502_v61, 0.0 }
 0xcc7   : > { %2503 = vpow2.f32 %v1360_v62  ;;  %1363 = vadd.xlane.f32.xlu1 %v1362_v63  ;;  %v2386_v63 = vld [vmem:[#allocation2 + $0x30] sm:$0xff] }
 0xccd   : > { %v2504_v0 = vpop.eup %2503 }
 0xcce   : > { %v1365_v47 = vsel %vm795_vm12, %v2504_v0, 0.0 }
 0xccf   : > { %1366 = vadd.xlane.f32.xlu2 %v1365_v47 }
 0xcd1   : > { %v1422_v1 = vpop.xlane.xlu0 %1421 }
 0xcd2   : > { %v1426_v2 = vsub.f32 %v1416_v51, %v1422_v1 }
 0xcd4   : > { %v1428_v28 = vmul.f32 1.442695, %v1426_v2 }
 0xcd6   : > { %2505 = vpow2.f32 %v1428_v28  ;;  %v2384_v28 = vld [vmem:[#allocation2 + $0x20] sm:$0xff] }
 0xcd9   : > { %v1425_v3 = vpop.xlane.xlu2 %1424 }
 0xcda   : > { %v1427_v4 = vsub.f32 %v1418_v54, %v1425_v3 }
 0xcdc   : > { %v2506_v5 = vpop.eup %2505  ;;  %v1430_v6 = vmul.f32 1.442695, %v1427_v4 }
 0xcdd   : > { %v1432_v29 = vsel %vm795_vm12, %v2506_v5, 0.0 }
 0xcde   : > { %2507 = vpow2.f32 %v1430_v6  ;;  %1433 = vadd.xlane.f32.xlu1 %v1432_v29 }
 0xce4   : > { %v2508_v7 = vpop.eup %2507  ;;  %v1445_v8 = vpop.permute.xlu0 %1444 }
 0xce5   : > { %1457 = vmatpush.bf16.msrb.mxu1 %v1445_v8  ;;  %v1435_v9 = vsel %vm795_vm12, %v2508_v7, 0.0 }
 0xce6   : > { %1436 = vadd.xlane.f32.xlu2 %v1435_v9 }
 0xd3a   : > { %v1364_v10 = vpop.xlane.xlu1 %1363 }
 0xd3b   : > { %2509 = vrcp.f32 %v1364_v10 }
 0xd41   : > { %v2510_v12 = vpop.eup %2509 }
 0xd42   : > { %v1367_v11 = vpop.xlane.xlu2 %1366  ;;  %v1370_v15 = vmul.f32 %v2510_v12, %v2502_v61 }
 0xd43   : > { %2511 = vrcp.f32 %v1367_v11 }
 0xd49   : > { %v2512_v14 = vpop.eup %2511 }
 0xd4a   : > { %v1371_v16 = vmul.f32 %v2512_v14, %v2504_v0  ;;  %v2385_v0 = vld [vmem:[#allocation2 + $0x28] sm:$0xff] }
 0xd4c   : > { %v1372_v17 = vpack.c.bf16 %v1371_v16, %v1370_v15 }
 0xd4e   : > { %2218 = vmatmul.msk.bf16.vlgmr.msrb.gmra.mxu3 %vm795_vm12, %v1372_v17 }
 0xd51   : > { %v1434_v18 = vpop.xlane.xlu1 %1433 }
 0xd52   : > { %2513 = vrcp.f32 %v1434_v18  ;;  %v2460_v18 = vld [vmem:[%s3179_s10 + $0x9] ss:$0 sm:$0xff] }
 0xd58   : > { %v2514_v22 = vpop.eup %2513 }
 0xd59   : > { %v1437_v21 = vpop.xlane.xlu2 %1436  ;;  %v1440_v24 = vmul.f32 %v2514_v22, %v2506_v5 }
 0xd5a   : > { %2515 = vrcp.f32 %v1437_v21 }
 0xd60   : > { %v2516_v23 = vpop.eup %2515 }
 0xd61   : > { %v1441_v25 = vmul.f32 %v2516_v23, %v2508_v7 }
 0xd63   : > { %v1442_v26 = vpack.c.bf16 %v1441_v25, %v1440_v24  ;;  %v2461_v24 = vld [vmem:[%s3179_s10 + $0xa] ss:$0 sm:$0xff] }
 0xd65   : > { %2224 = vmatmul.msk.bf16.vlgmr.msrb.gmra.mxu1 %vm795_vm12, %v1442_v26 }
 0xdd1   : > { %v1385_v34 = vpop.f32.mrf.mxu3 }
 0xdd9   : > { %v1387_v35 = vpop.f32.mrf.mxu3 }
 0xdda   : > { %v1390_v36 = vpack.c.bf16 %v1387_v35, %v1385_v34  ;;  %v2395_v34 = vld [vmem:[%s3178_s9 + $0x78] sm:$0xff]  ;;  %v2394_v35 = vld [vmem:[%s3178_s9 + $0x70] sm:$0xff] }
 0xddb   : > { %1728 = vmatpush.bf16.msra.mxu1 %v2395_v34 }
 0xddc   : > { %2246 = vmatmul.msk.bf16.vlgmr.msra.gmra.mxu3 %vm774_vm11, %v1390_v36  ;;  %v2393_v36 = vld [vmem:[%s3178_s9 + $0x68] sm:$0xff] }
 0xddf   : > { %1729 = vmatpush.bf16.msra.mxu1 %v2394_v35  ;;  %v2626_v35 = vmov 2  }
 0xde0   : > { %2441 = vset.pattern.permute.xlu0 %v2626_v35  ;;  %2442 = vset.pattern.permute.xlu2 %v2626_v35 }
 0xde1   : > { %2443 = vset.pattern.permute.xlu1 %v2626_v35 }
 0xde2   : > { %v1459_v37 = vpop.f32.mrf.mxu1 }
 0xde3   : > { %1730 = vmatpush.bf16.msra.mxu1 %v2393_v36 }
 0xdea   : > { %v1461_v38 = vpop.f32.mrf.mxu1 }
 0xdeb   : > { %v1464_v39 = vpack.c.bf16 %v1461_v38, %v1459_v37  ;;  %v2392_v37 = vld [vmem:[%s3178_s9 + $0x60] sm:$0xff]  ;;  %v2391_v38 = vld [vmem:[%s3178_s9 + $0x58] sm:$0xff] }
 0xdec   : > { %1731 = vmatpush.bf16.msra.mxu1 %v2392_v37 }
 0xded   : > { %2237 = vmatmul.msk.bf16.vlgmr.msrb.gmra.mxu2 %vm774_vm11, %v1464_v39  ;;  %v2390_v39 = vld [vmem:[%s3178_s9 + $0x50] sm:$0xff] }
 0xdf0   : > { %1732 = vmatpush.bf16.msra.mxu1 %v2391_v38 }
 0xdf4   : > { %1733 = vmatpush.bf16.msra.mxu1 %v2390_v39 }
 0xe5f   : > { %v1522_v40 = vpop.f32.mrf.mxu3 }
 0xe67   : > { %v1524_v48 = vpop.f32.mrf.mxu3 }
 0xe70   : > { %v1493_v42 = vpop.f32.mrf.mxu2 }
 0xe71   : > { %v1523_v43 = vadd.f32 %v1522_v40, %v1493_v42  ;;  %v2389_v40 = vld [vmem:[%s3178_s9 + $0x48] sm:$0xff]  ;;  %v2462_v42 = vld [vmem:[%s3180_s11 + $0x1] ss:$0 sm:$0xff] }
 0xe72   : > { %1734 = vmatpush.bf16.msra.mxu1 %v2389_v40 }
 0xe73   : > { %v1530_v44 = vadd.f32 %v2459_v41, %v1523_v43 }
 0xe75   : > { %v1532_v45 = vadd.f32 %v1530_v44, %v3039_v19 }
 0xe77   : > { %v1536_v46 = vsel %vm621_vm3, %v1532_v45, 0.0 }
 0xe78   : > { %1537 = vadd.xlane.f32.xlu1 %v1536_v46  ;;  %v1495_v49 = vpop.f32.mrf.mxu2 }
 0xe79   : > { %v1525_v50 = vadd.f32 %v1524_v48, %v1495_v49 }
 0xe7b   : > { %v1531_v51 = vadd.f32 %v2459_v41, %v1525_v50  ;;  %v2388_v41 = vld [vmem:[%s3178_s9 + $0x40] sm:$0xff] }
 0xe7c   : > { %1735 = vmatpush.bf16.msra.mxu1 %v2388_v41 }
 0xe7d   : > { %v1533_v52 = vadd.f32 %v1531_v51, %v3041_v20  ;;  %v2387_v20 = vld [vmem:[#allocation2 + $0x38] sm:$0xff] }
 0xe7e   : > { %1632 = vmatpush.bf16.msra.mxu0 %v2387_v20 }
 0xe7f   : > { %v1539_v53 = vsel %vm621_vm3, %v1533_v52, 0.0 }
 0xe80   : > { %1540 = vadd.xlane.f32.xlu2 %v1539_v53 }
 0xe82   : > { %1633 = vmatpush.bf16.msra.mxu0 %v2386_v63 }
 0xe86   : > { %1634 = vmatpush.bf16.msra.mxu0 %v2385_v0 }
 0xe8a   : > { %1635 = vmatpush.bf16.msra.mxu0 %v2384_v28 }
 0xeeb   : > { %v1538_v54 = vpop.xlane.xlu1 %1537 }
 0xeec   : > { %v1542_v55 = vmul.f32 %v1538_v54, %v2787_v30 }
 0xeee   : > { %v1544_v56 = vsub.f32 %v1532_v45, %v1542_v55 }
 0xef0   : > { %v1546_v57 = vmul.f32 %v1544_v56, %v1544_v56 }
 0xef2   : > { %v1548_v58 = vsel %vm621_vm3, %v1546_v57, 0.0 }
 0xef3   : > { %1549 = vadd.xlane.f32.xlu1 %v1548_v58  ;;  %v1541_v19 = vpop.xlane.xlu2 %1540 }
 0xef4   : > { %v1543_v59 = vmul.f32 %v1541_v19, %v2787_v30 }
 0xef6   : > { %v1545_v60 = vsub.f32 %v1533_v52, %v1543_v59 }
 0xef8   : > { %v1547_v61 = vmul.f32 %v1545_v60, %v1545_v60 }
 0xefa   : > { %v1551_v62 = vsel %vm621_vm3, %v1547_v61, 0.0 }
 0xefb   : > { %1552 = vadd.xlane.f32.xlu2 %v1551_v62 }
 0xf66   : > { %v1550_v47 = vpop.xlane.xlu1 %1549 }
 0xf67   : > { %v1554_v1 = vmul.f32 %v1550_v47, %v2787_v30  ;;  %v2463_v47 = vld [vmem:[%s3179_s10 + $0xb] ss:$0 sm:$0xff] }
 0xf69   : > { %v1556_v2 = vadd.f32 1e-12, %v1554_v1 }
 0xf6b   : > { %2517 = vrsqrt.f32 %v1556_v2  ;;  %vm1564_vm11 = vweird.f32 %v1556_v2 }
 0xf6e   : > { %v1553_v3 = vpop.xlane.xlu2 %1552 }
 0xf6f   : > { %v1555_v4 = vmul.f32 %v1553_v3, %v2787_v30 }
 0xf71   : > { %v2518_v5 = vpop.eup %2517  ;;  %v1557_v6 = vadd.f32 1e-12, %v1555_v4 }
 0xf72   : > { %v1559_v29 = vmul.f32 %v2518_v5, %v1556_v2  ;;  %vm1565_vm10 = vweird.f32 %v2518_v5 }
 0xf73   : > { %2519 = vrsqrt.f32 %v1557_v6  ;;  %vm1566_vm12 = vmor %vm1564_vm11, %vm1565_vm10  ;;  %vm1574_vm14 = vweird.f32 %v1557_v6  ;;  %vm1858_vm11 = vcmp.lt.s32.totalorder %v2775_v13, 9 }
 0xf74   : > { %v1560_v7 = vmul.f32 %v2518_v5, %v1559_v29 }
 0xf76   : > { %v1561_v8 = vmul.f32 0.5, %v1560_v7 }
 0xf78   : > { %v1562_v9 = vsub.f32 1.5, %v1561_v8 }
 0xf79   : > { %v2520_v10 = vpop.eup %2519 }
 0xf7a   : > { %v1563_v11 = vmul.f32 %v2518_v5, %v1562_v9  ;;  %v1569_v12 = vmul.f32 %v2520_v10, %v1557_v6  ;;  %vm1575_vm13 = vweird.f32 %v2520_v10 }
 0xf7b   : > { %vm1576_vm15 = vmor %vm1574_vm14, %vm1575_vm13  ;;  %vm1905_vm13 = vcmp.eq.s32.totalorder %v2775_v13, 9  ;;  %vm1918_vm14 = vcmp.eq.s32.totalorder %v2775_v13, 10 }
 0xf7c   : > { %v1570_v14 = vmul.f32 %v2520_v10, %v1569_v12  ;;  %v1567_v15 = vsel %vm1566_vm12, %v2518_v5, %v1563_v11 }
 0xf7d   : > { %v1578_v21 = vmul.f32 %v1567_v15, %v1544_v56 }
 0xf7e   : > { %v1571_v16 = vmul.f32 0.5, %v1570_v14 }
 0xf7f   : > { %v1581_v25 = vmul.f32 %v2460_v18, %v1578_v21  ;;  %v2538_v21 = vld [vmem:[%s2747_s18 + $0x8] sm:$0xff] }
 0xf80   : > { %v1572_v17 = vsub.f32 1.5, %v1571_v16 }
 0xf81   : > { %v1584_v31 = vadd.f32 %v2461_v24, %v1581_v25 }
 0xf82   : > { %v1573_v22 = vmul.f32 %v2520_v10, %v1572_v17 }
 0xf84   : > { %v1577_v23 = vsel %vm1576_vm15, %v2520_v10, %v1573_v22  ;;  %v2399_v22 = vld [vmem:[#allocation4 + $0x18] sm:$0xff] }
 0xf85   : > { %v1579_v26 = vmul.f32 %v1577_v23, %v1545_v60  ;;  %1840 = vmatpush.bf16.msra.mxu2 %v2399_v22  ;;  %v2398_v23 = vld [vmem:[#allocation4 + $0x10] sm:$0xff] }
 0xf87   : > { %v1582_v27 = vmul.f32 %v2460_v18, %v1579_v26  ;;  %v2537_v18 = vld [vmem:[%s2747_s18] sm:$0xff] }
 0xf89   : > { %v1585_v32 = vadd.f32 %v2461_v24, %v1582_v27  ;;  %1841 = vmatpush.bf16.msra.mxu2 %v2398_v23  ;;  %v2397_v24 = vld [vmem:[#allocation4 + $0x8] sm:$0xff] }
 0xf8b   : > { %v1586_v33 = vpack.c.bf16 %v1585_v32, %v1584_v31 }
 0xf8d   : > { %2267 = vmatmul.msk.bf16.vlgmr.msra.gmra.mxu0 %vm621_vm3, %v1586_v33  ;;  %1842 = vmatpush.bf16.msra.mxu2 %v2397_v24 }
0x100a   : > { %v1637_v43 = vpop.f32.mrf.mxu0 }
0x100b   : > { %v1638_v44 = vadd.f32 %v2462_v42, %v1637_v43 }
0x100d   : > { %v1644_v45 = vmul.f32 0.044715, %v1638_v44  ;;  %v1642_v60 = vmul.f32 0.5, %v1638_v44 }
0x100f   : > { %v1646_v46 = vmul.f32 %v1644_v45, %v1638_v44 }
0x1011   : > { %v1648_v48 = vmul.f32 %v1646_v46, %v1638_v44 }
0x1012   : > { %v1639_v49 = vpop.f32.mrf.mxu0 }
0x1013   : > { %v1650_v50 = vadd.f32 %v1648_v48, %v1638_v44  ;;  %v1640_v51 = vadd.f32 %v2462_v42, %v1639_v49 }
0x1015   : > { %v1645_v52 = vmul.f32 0.044715, %v1640_v51  ;;  %v1652_v53 = vmul.f32 0.7978846, %v1650_v50  ;;  %v1643_v61 = vmul.f32 0.5, %v1640_v51 }
0x1017   : > { %v1647_v54 = vmul.f32 %v1645_v52, %v1640_v51  ;;  %2521 = vtanh.f32 %v1652_v53 }
0x1019   : > { %v1649_v55 = vmul.f32 %v1647_v54, %v1640_v51 }
0x101b   : > { %v1651_v56 = vadd.f32 %v1649_v55, %v1640_v51  ;;  %v2464_v51 = vld [vmem:[%s3179_s10 + $0xc] ss:$0 sm:$0xff]  ;;  %v2465_v55 = vld [vmem:[%s3179_s10 + $0xd] ss:$0 sm:$0xff] }
0x101d   : > { %v1653_v57 = vmul.f32 0.7978846, %v1651_v56  ;;  %v2522_v58 = vpop.eup %2521 }
0x101e   : > { %v1656_v19 = vadd.f32 1.0, %v2522_v58 }
0x101f   : > { %2523 = vtanh.f32 %v1653_v57 }
0x1020   : > { %v1658_v20 = vmul.f32 %v1656_v19, %v1642_v60 }
0x1025   : > { %v2524_v59 = vpop.eup %2523 }
0x1026   : > { %v1657_v62 = vadd.f32 1.0, %v2524_v59 }
0x1028   : > { %v1659_v63 = vmul.f32 %v1657_v62, %v1643_v61  ;;  %v523_v61 = vcvt.s32.f32 %v2538_v21 }
0x102a   : > { %v1660_v0 = vpack.c.bf16 %v1659_v63, %v1658_v20  ;;  %vm1851_vm9 = vcmp.gt.f32.partialorder %v523_v61, 0.5  ;;  %v2627_v20 = vmov 0.0  }
0x102c   : > { %1736 = vmatmul.bf16.vlgmr.msra.gmra.mxu1 %v1660_v0 }
0x10a9   : > { %v1737_v1 = vpop.f32.mrf.mxu1 }
0x10aa   : > { %v1738_v2 = vadd.f32 %v2463_v47, %v1737_v1 }
0x10ac   : > { %v1742_v28 = vadd.f32 %v1738_v2, %v1584_v31  ;;  %v2396_v31 = vld [vmem:[#allocation4] sm:$0xff] }
0x10ad   : > { %1843 = vmatpush.bf16.msra.mxu2 %v2396_v31  ;;  %v2466_v2 = vld [vmem:[%s3182_s13] ss:$0 sm:$0xff] }
0x10ae   : > { %v1746_v3 = vsel %vm621_vm3, %v1742_v28, 0.0 }
0x10af   : > { %1747 = vadd.xlane.f32.xlu1 %v1746_v3 }
0x10b1   : > { %v1739_v4 = vpop.f32.mrf.mxu1 }
0x10b2   : > { %v1740_v5 = vadd.f32 %v2463_v47, %v1739_v4 }
0x10b4   : > { %v1743_v6 = vadd.f32 %v1740_v5, %v1585_v32  ;;  %v522_v32 = vcvt.s32.f32 %v2537_v18 }
0x10b6   : > { %v1749_v29 = vsel %vm621_vm3, %v1743_v6, 0.0  ;;  %vm1850_vm0 = vcmp.gt.f32.partialorder %v522_v32, 0.5 }
0x10b7   : > { %1750 = vadd.xlane.f32.xlu0 %v1749_v29 }
0x1122   : > { %v1748_v7 = vpop.xlane.xlu1 %1747 }
0x1123   : > { %v1752_v8 = vmul.f32 %v1748_v7, %v2787_v30 }
0x1125   : > { %v1754_v9 = vsub.f32 %v1742_v28, %v1752_v8 }
0x1127   : > { %v1756_v10 = vmul.f32 %v1754_v9, %v1754_v9 }
0x1129   : > { %v1758_v11 = vsel %vm621_vm3, %v1756_v10, 0.0 }
0x112a   : > { %v1751_v12 = vpop.xlane.xlu0 %1750  ;;  %1759 = vadd.xlane.f32.xlu2 %v1758_v11 }
0x112b   : > { %v1753_v14 = vmul.f32 %v1751_v12, %v2787_v30 }
0x112d   : > { %v1755_v15 = vsub.f32 %v1743_v6, %v1753_v14 }
0x112f   : > { %v1757_v16 = vmul.f32 %v1755_v15, %v1755_v15 }
0x1131   : > { %v1761_v17 = vsel %vm621_vm3, %v1757_v16, 0.0 }
0x1132   : > { %1762 = vadd.xlane.f32.xlu1 %v1761_v17 }
0x1142   : > { %1852 = vrot.lane.b32.xlu2 %v2537_v18, %s2625_s24 }
0x114b   : > { %1854 = vrot.lane.b32.xlu1 %v2538_v21, %s2625_s24 }
0x119d   : > { %v1760_v25 = vpop.xlane.xlu2 %1759 }
0x119e   : > { %v1764_v26 = vmul.f32 %v1760_v25, %v2787_v30 }
0x11a0   : > { %v1766_v27 = vadd.f32 1e-12, %v1764_v26 }
0x11a2   : > { %2525 = vrsqrt.f32 %v1766_v27  ;;  %vm1774_vm2 = vweird.f32 %v1766_v27 }
0x11a5   : > { %v1763_v33 = vpop.xlane.xlu1 %1762  ;;  %v1853_v34 = vpop.permute.xlu2 %1852 }
0x11a6   : > { %v1765_v36 = vmul.f32 %v1763_v33, %v2787_v30  ;;  %v1856_v37 = vsel %vm1850_vm0, %v1853_v34, 4294967196 }
0x11a7   : > { %1882 = vperm.xlu0 %2441, %v1856_v37   ;;  %vm1895_vm8 = vcmp.ne.s32.totalorder %v1856_v37, 4294967196 }
0x11a8   : > { %v2526_v38 = vpop.eup %2525  ;;  %v1767_v39 = vadd.f32 1e-12, %v1765_v36  ;;  %v2336_v63 = vsel %vm1895_vm8, 1.0, %v2627_v20 }
0x11a9   : > { %v1769_v40 = vmul.f32 %v2526_v38, %v1766_v27  ;;  %vm1775_vm1 = vweird.f32 %v2526_v38 }
0x11aa   : > { %2527 = vrsqrt.f32 %v1767_v39  ;;  %vm1776_vm4 = vmor %vm1774_vm2, %vm1775_vm1  ;;  %vm1784_vm6 = vweird.f32 %v1767_v39 }
0x11ab   : > { %v1770_v41 = vmul.f32 %v2526_v38, %v1769_v40 }
0x11ad   : > { %v1771_v42 = vmul.f32 0.5, %v1770_v41 }
0x11af   : > { %v1772_v43 = vsub.f32 1.5, %v1771_v42 }
0x11b0   : > { %v2528_v44 = vpop.eup %2527 }
0x11b1   : > { %v1773_v45 = vmul.f32 %v2526_v38, %v1772_v43  ;;  %v1779_v46 = vmul.f32 %v2528_v44, %v1767_v39  ;;  %vm1785_vm5 = vweird.f32 %v2528_v44 }
0x11b2   : > { %vm1786_vm7 = vmor %vm1784_vm6, %vm1785_vm5 }
0x11b3   : > { %v1780_v48 = vmul.f32 %v2528_v44, %v1779_v46  ;;  %v1777_v49 = vsel %vm1776_vm4, %v2526_v38, %v1773_v45 }
0x11b4   : > { %v1788_v52 = vmul.f32 %v1777_v49, %v1754_v9 }
0x11b5   : > { %v1781_v30 = vmul.f32 0.5, %v1780_v48 }
0x11b6   : > { %v1791_v56 = vmul.f32 %v2464_v51, %v1788_v52 }
0x11b7   : > { %v1782_v50 = vsub.f32 1.5, %v1781_v30 }
0x11b8   : > { %v1794_v19 = vadd.f32 %v2465_v55, %v1791_v56 }
0x11b9   : > { %v1783_v53 = vmul.f32 %v2528_v44, %v1782_v50 }
0x11bb   : > { %v1787_v54 = vsel %vm1786_vm7, %v2528_v44, %v1783_v53 }
0x11bc   : > { %v1789_v57 = vmul.f32 %v1787_v54, %v1755_v15 }
0x11bd   : > { %v1855_v62 = vpop.permute.xlu1 %1854 }
0x11be   : > { %v1792_v58 = vmul.f32 %v2464_v51, %v1789_v57  ;;  %v1857_v0 = vsel %vm1851_vm9, %v1855_v62, 4294967196 }
0x11bf   : > { %vm1896_vm10 = vcmp.ne.s32.totalorder %v1857_v0, 4294967196 }
0x11c0   : > { %v1795_v59 = vadd.f32 %v2465_v55, %v1792_v58  ;;  %v2337_v47 = vsel %vm1896_vm10, 1.0, %v2627_v20 }
0x11c1   : > { %v2444_v1 = vpack.i.bf16 %v2337_v47, %v2336_v63 }
0x11c2   : > { %v1796_v60 = vpack.c.bf16 %v1795_v59, %v1794_v19 }
0x11c4   : > { %2335 = vmatmul.msk.bf16.vlgmr.msra.gmra.mxu2 %vm621_vm3, %v1796_v60 }
0x1219   : > { %v1883_v15 = vpop.permute.xlu0 %1882 }
0x121a   : > { %vm1887_vm3 = vcmp.eq.s32.totalorder %v2775_v13, %v1883_v15 }
0x1247   : > { %v1845_v28 = vpop.f32.mrf.mxu2 }
0x1248   : > { %v1846_v3 = vadd.f32 %v2466_v2, %v1845_v28 }
0x124a   : > { %v1859_v4 = vsel %vm1858_vm11, %v1846_v3, -1e+09  ;;  %v1889_v17 = vsel %vm1887_vm3, %v1846_v3, 0.0 }
0x124b   : > { %1861 = vmax.xlane.f32.xlu2 %v1859_v4 }
0x124f   : > { %v1847_v5 = vpop.f32.mrf.mxu2 }
0x1250   : > { %v1848_v6 = vadd.f32 %v2466_v2, %v1847_v5 }
0x1252   : > { %v1860_v29 = vsel %vm1858_vm11, %v1848_v6, -1e+09 }
0x1253   : > { %1863 = vmax.xlane.f32.xlu1 %v1860_v29 }
0x1263   : > { %1885 = vperm.xlu2 %2442, %v1857_v0  }
0x12be   : > { %v1862_v7 = vpop.xlane.xlu2 %1861 }
0x12bf   : > { %v1865_v8 = vsub.f32 %v1859_v4, %v1862_v7 }
0x12c1   : > { %v1867_v9 = vmul.f32 1.442695, %v1865_v8 }
0x12c3   : > { %2529 = vpow2.f32 %v1867_v9 }
0x12c6   : > { %v1864_v10 = vpop.xlane.xlu1 %1863  ;;  %v1886_v18 = vpop.permute.xlu2 %1885 }
0x12c7   : > { %v1866_v11 = vsub.f32 %v1860_v29, %v1864_v10  ;;  %vm1888_vm12 = vcmp.eq.s32.totalorder %v2775_v13, %v1886_v18 }
0x12c8   : > { %v1890_v21 = vsel %vm1888_vm12, %v1848_v6, 0.0 }
0x12c9   : > { %v2530_v12 = vpop.eup %2529  ;;  %v1869_v14 = vmul.f32 1.442695, %v1866_v11 }
0x12ca   : > { %1871 = vadd.xlane.f32.xlu1 %v2530_v12 }
0x12cb   : > { %2531 = vpow2.f32 %v1869_v14 }
0x12d1   : > { %v2532_v16 = vpop.eup %2531 }
0x12d2   : > { %1873 = vadd.xlane.f32.xlu0 %v2532_v16  ;;  %1891 = vadd.xlane.f32.xlu1 %v1889_v17 }
0x12da   : > { %1893 = vadd.xlane.f32.xlu1 %v1890_v21 }
0x133d   : > { %v1872_v22 = vpop.xlane.xlu1 %1871 }
0x133e   : > { %2533 = vlog2.f32 %v1872_v22 }
0x1344   : > { %v2534_v23 = vpop.eup %2533 }
0x1345   : > { %v1876_v24 = vmul.f32 0.6931472, %v2534_v23  ;;  %v1874_v25 = vpop.xlane.xlu0 %1873  ;;  %v1892_v26 = vpop.xlane.xlu1 %1891 }
0x1346   : > { %2535 = vlog2.f32 %v1874_v25 }
0x1347   : > { %v1879_v27 = vadd.f32 %v1876_v24, %v1862_v7 }
0x1349   : > { %v1901_v31 = vsub.f32 %v1879_v27, %v1892_v26 }
0x134b   : > { %v1903_v32 = vmul.f32 %v2336_v63, %v1901_v31 }
0x134c   : > { %v2536_v33 = vpop.eup %2535 }
0x134d   : > { %v1878_v34 = vmul.f32 0.6931472, %v2536_v33  ;;  %1908 = vperm.xlu2 %2442, %v1903_v32   ;;  %v1894_v36 = vpop.xlane.xlu1 %1893 }
0x134f   : > { %v1880_v35 = vadd.f32 %v1878_v34, %v1864_v10 }
0x1351   : > { %v1902_v37 = vsub.f32 %v1880_v35, %v1894_v36 }
0x1353   : > { %v1904_v38 = vmul.f32 %v2337_v47, %v1902_v37 }
0x1355   : > { %1913 = vperm.xlu1 %2443, %v1904_v38   ;;  %2445 = vperm.xlu2 %2442, %v2444_v1  }
0x13a7   : > { %v1909_v39 = vpop.permute.xlu2 %1908 }
0x13a8   : > { %v1916_v42 = vsel %vm1905_vm13, %v1909_v39, %v1846_v3 }
0x13af   : > { %v2446_v40 = vpop.permute.xlu2 %2445 }
0x13b0   : > { %v2447_v41 = vunpack.i.l.bf16 %v2446_v40  ;;  %v2448_v44 = vunpack.i.h.bf16 %v2446_v40 }
0x13b2   : > { %v1929_v43 = vsel %vm1918_vm14, %v2447_v41, %v1916_v42 }
0x13b3   : > { %1931 = vst [vmem:[%s517_s20] sm:$0xff] %v1929_v43 }
0x13c7   : > { %v1914_v45 = vpop.permute.xlu1 %1913 }
0x13c8   : > { %v1917_v46 = vsel %vm1905_vm13, %v1914_v45, %v1848_v6 }
0x13c9   : > { %v1930_v48 = vsel %vm1918_vm14, %v2448_v44, %v1917_v46 }
0x13ca   : > { %1932 = vst [vmem:[%s517_s20 + $0x8] sm:$0xff] %v1930_v48 }
0x13cb PF: > { %s26_s29 = sadd.s32 1, %s2613_s29  }
0x13cc   : > { %p23_p8 = scmp.ge.s32.totalorder %s26_s29, 4  }
0x13ce   :  { %25 = sbr.rel (!%p23_p8) target bundleno = 2 (0x2), region = 125 }
0x13d3   :  { %1955 = vsyncpa [#allocation3], 1 }
0x13d4   :  { %1957 = vsyncpa [#allocation3 + $0x1], 1 }
0x13d5   :  { %1958 = vsyncpa [#allocation5], 1 }

</bundles_post_ra>
